<compile_context>
chip_gen: v7x
topology: tpu7x:2x2x1
jax: 0.10.0
libtpu: 0.0.40
codegen_flags: <defaults>
</compile_context>

<pallas_src>
import functools

import jax
import jax.numpy as jnp
import numpy as np
from jax.experimental import pallas as pl
from jax.experimental.pallas import tpu as pltpu

EPS = 1e-5
_CDT = jnp.bfloat16          # MXU input dtype (accumulation is always f32)


# ---------------------------------------------------------------------------
# Fused bottleneck kernel (one grid step == one image)
# ---------------------------------------------------------------------------
def _bottleneck_kernel(*refs, H, W, stride, has_sc_conv):
    it = iter(refs)
    x_ref = next(it)
    w1_ref = next(it); b1_ref = next(it)
    w2_ref = next(it); b2_ref = next(it)
    w3_ref = next(it); b3_ref = next(it)
    ws_ref = bs_ref = xs_ref = None
    if has_sc_conv:
        ws_ref = next(it); bs_ref = next(it)
        if stride > 1:
            xs_ref = next(it)
    o_ref = next(it)
    h1p_ref = next(it)                       # bf16 (H+2, W+2, width) halo scratch
    hp_ref = next(it) if stride > 1 else None  # f32 (Ho, W, width) pool scratch

    Cin = x_ref.shape[-1]
    width = w1_ref.shape[-1]
    Cexp = o_ref.shape[-1]
    Ho, Wo = H // stride, W // stride

    # ---- conv1: 1x1 conv (BN scale folded into weights) + bias + ReLU ----
    x2d = x_ref[...].reshape(H * W, Cin)                       # f32 or bf16
    h1 = jnp.dot(x2d.astype(_CDT), w1_ref[...],
                 preferred_element_type=jnp.float32)
    h1 = jnp.maximum(h1 + b1_ref[...], 0.0)                    # (H*W, width) f32
    h1b = h1.astype(_CDT).reshape(H, W, width)                 # single bf16 cast

    # ---- write bf16 halo scratch; every Ref store is leading-dim aligned ----
    zcol = jnp.zeros((H, 1, width), _CDT)
    h1p_ref[1:H + 1, :, :] = jnp.concatenate([zcol, h1b, zcol], axis=1)
    zrow = jnp.zeros((1, W + 2, width), _CDT)
    h1p_ref[0:1, :, :] = zrow                                  # border rows only
    h1p_ref[H + 1:H + 2, :, :] = zrow

    # ---- conv2: 3x3 conv (+bias) + BN + ReLU as ONE im2col matmul ----
    taps = []
    for dy in range(3):
        rows = h1p_ref[dy:dy + H, :, :]                        # contiguous rows
        for dx in range(3):
            taps.append(rows[:, dx:dx + W, :])                 # value-level shift
    slab = jnp.concatenate(taps, axis=-1).reshape(H * W, 9 * width)  # bf16
    h2 = jnp.dot(slab, w2_ref[...], preferred_element_type=jnp.float32)
    h2 = jnp.maximum(h2 + b2_ref[...], 0.0)                    # (H*W, width) f32

    # ---- avg-pool(stride), moved before conv3 (commutes with 1x1 conv+BN) ----
    if stride > 1:
        # pool along H on values (free leading-dim split) ...
        h2r = h2.reshape(Ho, stride, W, width)
        hsum = h2r[:, 0, :, :]
        for r in range(1, stride):
            hsum = hsum + h2r[:, r, :, :]
        # ... then along W via strided (slice-only) reads from f32 scratch.
        hp_ref[...] = hsum                                     # (Ho, W, width)
        pooled = hp_ref[:, pl.ds(0, Wo, stride), :]
        for j in range(1, stride):
            pooled = pooled + hp_ref[:, pl.ds(j, Wo, stride), :]
        h2p = (pooled * (1.0 / (stride * stride))).reshape(Ho * Wo, width)
    else:
        h2p = h2

    # ---- conv3: 1x1 conv (scale folded) + bias (no ReLU) ----
    h3 = jnp.dot(h2p.astype(_CDT), w3_ref[...],
                 preferred_element_type=jnp.float32)
    h3 = h3 + b3_ref[...]                                      # (Ho*Wo, Cexp) f32

    # ---- shortcut ----
    if has_sc_conv:
        if stride > 1:
            xs2d = xs_ref[...].reshape(Ho * Wo, Cin)           # pre-subsampled
        else:
            xs2d = x2d                                         # reuse resident x
        sc = jnp.dot(xs2d.astype(_CDT), ws_ref[...],
                     preferred_element_type=jnp.float32)
        sc = sc + bs_ref[...]
    else:
        # identity path: x was fed in f32, so the residual add is exact.
        sc = x2d.astype(jnp.float32)

    # ---- residual add + final ReLU ----
    o_ref[...] = jnp.maximum(h3 + sc, 0.0).reshape(1, Ho, Wo, Cexp)


# ---------------------------------------------------------------------------
# BN folding + wrapper
# ---------------------------------------------------------------------------
def fold_bn(g, b, m, v, conv_bias=None):
    scale = g / jnp.sqrt(v + EPS)                  # per-output-channel scale
    bias = b - m * scale
    if conv_bias is not None:
        bias = bias + conv_bias * scale
    return scale.astype(jnp.float32), bias.reshape(1, -1).astype(jnp.float32)


def bottleneck_forward(x_nchw, P, stride):
    x = jnp.transpose(x_nchw, (0, 2, 3, 1))                    # NCHW -> NHWC
    N, H, W, Cin = x.shape
    width = P['w1'].shape[1]
    Cexp = P['w3'].shape[1]
    assert H % stride == 0 and W % stride == 0, "H, W must be divisible by stride"
    Ho, Wo = H // stride, W // stride
    has_sc_conv = (stride != 1) or (Cin != Cexp)

    s1, b1 = fold_bn(*P['bn1'])
    s2, b2 = fold_bn(*P['bn2'], conv_bias=P['b2conv'])
    s3, b3 = fold_bn(*P['bn3'])

    # Fold BN scales into the conv weights host-side (kernel only adds bias).
    w1s = (P['w1'] * s1[None, :]).astype(_CDT)                            # (Cin, width)
    w2s = (P['w2'] * s2[None, None, None, :]).reshape(9 * width, width).astype(_CDT)
    w3s = (P['w3'] * s3[None, :]).astype(_CDT)                            # (width, Cexp)

    # Identity blocks get f32 x (exact residual); projection blocks get bf16.
    xdt = _CDT if has_sc_conv else jnp.float32

    args = [x.astype(xdt), w1s, b1, w2s, b2, w3s, b3]
    in_specs = [
        pl.BlockSpec((1, H, W, Cin), lambda n: (n, 0, 0, 0)),             # x
        pl.BlockSpec((Cin, width), lambda n: (0, 0)),                     # w1 (scaled)
        pl.BlockSpec((1, width), lambda n: (0, 0)),                       # bias1
        pl.BlockSpec((9 * width, width), lambda n: (0, 0)),               # w2 (im2col)
        pl.BlockSpec((1, width), lambda n: (0, 0)),                       # bias2
        pl.BlockSpec((width, Cexp), lambda n: (0, 0)),                    # w3 (scaled)
        pl.BlockSpec((1, Cexp), lambda n: (0, 0)),                        # bias3
    ]
    if has_sc_conv:
        ss, bs = fold_bn(*P['bns'])
        wss = (P['ws'] * ss[None, :]).astype(_CDT)
        args += [wss, bs]
        in_specs += [pl.BlockSpec((Cin, Cexp), lambda n: (0, 0)),         # shortcut w
                     pl.BlockSpec((1, Cexp), lambda n: (0, 0))]           # shortcut bias
        if stride > 1:
            # Pre-subsampled x for the strided 1x1 shortcut (tiny extra read;
            # avoids mixed int/strided Ref indexing inside the kernel).
            xs = x[:, ::stride, ::stride, :].astype(_CDT)
            args.append(xs)
            in_specs.append(pl.BlockSpec((1, Ho, Wo, Cin), lambda n: (n, 0, 0, 0)))

    scratch_shapes = [pltpu.VMEM((H + 2, W + 2, width), _CDT)]            # bf16 halo
    if stride > 1:
        scratch_shapes.append(pltpu.VMEM((Ho, W, width), jnp.float32))    # pool buf

    kernel = functools.partial(_bottleneck_kernel, H=H, W=W, stride=stride,
                               has_sc_conv=has_sc_conv)

    out = pl.pallas_call(
        kernel,
        out_shape=jax.ShapeDtypeStruct((N, Ho, Wo, Cexp), jnp.float32),
        grid=(N,),
        in_specs=in_specs,
        out_specs=pl.BlockSpec((1, Ho, Wo, Cexp), lambda n: (n, 0, 0, 0)),
        scratch_shapes=scratch_shapes,
        compiler_params=pltpu.CompilerParams(
            dimension_semantics=("parallel",),      # shard batch across TCs
            vmem_limit_bytes=32 * 1024 * 1024),
    )(*args)
    return jnp.transpose(out, (0, 3, 1, 2))                    # back to NCHW


# ---------------------------------------------------------------------------
# Parameter init (inference-mode BN running stats)
# ---------------------------------------------------------------------------
def init_params(key, in_channels, out_channels, groups=1, base_width=64):
    width = int(out_channels * (base_width / 64.0)) * groups
    cexp = 4 * out_channels
    ks = jax.random.split(key, 9)

    def w(k, shape, scale=0.1):
        return scale * jax.random.normal(k, shape, jnp.float32)

    def bn(k, c):
        kg, kb, km, kv = jax.random.split(k, 4)
        return (0.5 + jax.random.uniform(kg, (c,), jnp.float32),
                0.1 * jax.random.normal(kb, (c,), jnp.float32),
                0.1 * jax.random.normal(km, (c,), jnp.float32),
                0.5 + jax.random.uniform(kv, (c,), jnp.float32))

    return dict(
        w1=w(ks[0], (in_channels, width)),
        bn1=bn(ks[1], width),
        w2=w(ks[2], (3, 3, width, width)),
        b2conv=0.1 * jax.random.normal(ks[3], (width,), jnp.float32),
        bn2=bn(ks[4], width),
        w3=w(ks[5], (width, cexp)),
        bn3=bn(ks[6], cexp),
        ws=w(ks[7], (in_channels, cexp)),
        bns=bn(ks[8], cexp),
    )


# ---------------------------------------------------------------------------
# Pure-JAX f32 reference (HIGHEST precision) for correctness check
# ---------------------------------------------------------------------------
def ref_forward(x_nchw, P, stride):
    x = jnp.transpose(x_nchw, (0, 2, 3, 1)).astype(jnp.float32)

    def bn(y, prm):
        g, b, m, v = prm
        return (y - m) / jnp.sqrt(v + EPS) * g + b

    def conv(xi, wi, s=1, pad='VALID'):
        return jax.lax.conv_general_dilated(
            xi, wi, (s, s), pad, dimension_numbers=('NHWC', 'HWIO', 'NHWC'),
            precision=jax.lax.Precision.HIGHEST)

    Cin = x.shape[-1]
    cexp = P['w3'].shape[1]
    h = jax.nn.relu(bn(conv(x, P['w1'][None, None, :, :]), P['bn1']))
    h = jax.nn.relu(bn(conv(h, P['w2'], pad=[(1, 1), (1, 1)]) + P['b2conv'],
                       P['bn2']))
    h = bn(conv(h, P['w3'][None, None, :, :]), P['bn3'])
    if stride >= 2:
        N, H, W, C = h.shape
        h = h.reshape(N, H // stride, stride, W // stride, stride, C).mean(
            axis=(2, 4))
    if stride != 1 or Cin != cexp:
        sc = bn(conv(x, P['ws'][None, None, :, :], s=stride), P['bns'])
    else:
        sc = x
    out = jax.nn.relu(h + sc)
    return jnp.transpose(out, (0, 3, 1, 2))


if __name__ == "__main__":
    key = jax.random.PRNGKey(0)
    k1, k2, k3, k4 = jax.random.split(key, 4)

    # Case 1: projection shortcut + stride-2 avg-pool path.
    N, Cin, H, W = 2, 8, 16, 16
    out_channels, stride = 4, 2          # width = 4, expansion*out = 16
    x = jax.random.normal(k1, (N, Cin, H, W), jnp.float32)
    P = init_params(k2, Cin, out_channels)
    out = jax.block_until_ready(bottleneck_forward(x, P, stride))
    ref = jax.block_until_ready(ref_forward(x, P, stride))
    assert out.shape == (N, 4 * out_channels, H // stride, W // stride), out.shape
    # bf16 matmul inputs / folded bf16 weights with f32 accumulation.
    np.testing.assert_allclose(np.asarray(out), np.asarray(ref),
                               rtol=2e-2, atol=2e-2)

    # Case 2: identity shortcut (stride=1, in_channels == expansion*out_channels).
    N2, Cin2, H2, W2 = 2, 16, 8, 8
    out_channels2, stride2 = 4, 1
    x2 = jax.random.normal(k3, (N2, Cin2, H2, W2), jnp.float32)
    P2 = init_params(k4, Cin2, out_channels2)
    out2 = jax.block_until_ready(bottleneck_forward(x2, P2, stride2))
    ref2 = jax.block_until_ready(ref_forward(x2, P2, stride2))
    assert out2.shape == (N2, 4 * out_channels2, H2, W2), out2.shape
    np.testing.assert_allclose(np.asarray(out2), np.asarray(ref2),
                               rtol=2e-2, atol=2e-2)

    print("KERNEL_OK")
</pallas_src>

<mosaic_0001>
module attributes {stable_mosaic.version = 11 : i64} {
  func.func @_bottleneck_kernel(%arg0: i32, %arg1: memref<1x16x16x8xbf16, #tpu.memory_space<vmem>>, %arg2: memref<8x4xbf16, #tpu.memory_space<vmem>>, %arg3: memref<1x4xf32, #tpu.memory_space<vmem>>, %arg4: memref<36x4xbf16, #tpu.memory_space<vmem>>, %arg5: memref<1x4xf32, #tpu.memory_space<vmem>>, %arg6: memref<4x16xbf16, #tpu.memory_space<vmem>>, %arg7: memref<1x16xf32, #tpu.memory_space<vmem>>, %arg8: memref<8x16xbf16, #tpu.memory_space<vmem>>, %arg9: memref<1x16xf32, #tpu.memory_space<vmem>>, %arg10: memref<1x8x8x8xbf16, #tpu.memory_space<vmem>>, %arg11: memref<1x8x8x16xf32, #tpu.memory_space<vmem>>, %arg12: memref<18x18x4xbf16, #tpu.memory_space<vmem>>, %arg13: memref<8x16x4xf32, #tpu.memory_space<vmem>>) attributes {dimension_semantics = [#tpu.dimension_semantics<parallel>], iteration_bounds = array<i64: 2>, scalar_prefetch = 0 : i64, scratch_operands = 2 : i64, tpu.core_type = #tpu.core_type<tc>, window_params = [{transform_indices = @transform_0, window_bounds = array<i64: 1, 16, 16, 8>}, {pipeline_mode = #tpu.pipeline_mode<synchronous>, transform_indices = @transform_1, window_bounds = array<i64: 8, 4>}, {pipeline_mode = #tpu.pipeline_mode<synchronous>, transform_indices = @transform_2, window_bounds = array<i64: 1, 4>}, {pipeline_mode = #tpu.pipeline_mode<synchronous>, transform_indices = @transform_3, window_bounds = array<i64: 36, 4>}, {pipeline_mode = #tpu.pipeline_mode<synchronous>, transform_indices = @transform_4, window_bounds = array<i64: 1, 4>}, {pipeline_mode = #tpu.pipeline_mode<synchronous>, transform_indices = @transform_5, window_bounds = array<i64: 4, 16>}, {pipeline_mode = #tpu.pipeline_mode<synchronous>, transform_indices = @transform_6, window_bounds = array<i64: 1, 16>}, {pipeline_mode = #tpu.pipeline_mode<synchronous>, transform_indices = @transform_7, window_bounds = array<i64: 8, 16>}, {pipeline_mode = #tpu.pipeline_mode<synchronous>, transform_indices = @transform_8, window_bounds = array<i64: 1, 16>}, {transform_indices = @transform_9, window_bounds = array<i64: 1, 8, 8, 8>}, {transform_indices = @transform_10, window_bounds = array<i64: 1, 8, 8, 16>}]} {
    %c0 = arith.constant 0 : index
    %c0_0 = arith.constant 0 : index
    %c0_1 = arith.constant 0 : index
    %c0_2 = arith.constant 0 : index
    %0 = vector.load %arg1[%c0, %c0_0, %c0_1, %c0_2] : memref<1x16x16x8xbf16, #tpu.memory_space<vmem>>, vector<1x16x16x8xbf16>
    %1 = vector.shape_cast %0 : vector<1x16x16x8xbf16> to vector<256x8xbf16>
    %c0_3 = arith.constant 0 : index
    %c0_4 = arith.constant 0 : index
    %2 = vector.load %arg2[%c0_3, %c0_4] : memref<8x4xbf16, #tpu.memory_space<vmem>>, vector<8x4xbf16>
    %cst = arith.constant dense<0.000000e+00> : vector<256x4xf32>
    %3 = tpu.matmul %1, %2, %cst {dimension_numbers = #tpu.dot_dimension_numbers<[1], [0], [0], [1], [0, 0, 1, 1], [], []>} : vector<256x8xbf16>, vector<8x4xbf16>, vector<256x4xf32> -> vector<256x4xf32>
    %c0_5 = arith.constant 0 : index
    %c0_6 = arith.constant 0 : index
    %4 = vector.load %arg3[%c0_5, %c0_6] : memref<1x4xf32, #tpu.memory_space<vmem>>, vector<1x4xf32>
    %5 = vector.broadcast %4 : vector<1x4xf32> to vector<256x4xf32>
    %6 = arith.addf %3, %5 : vector<256x4xf32>
    %cst_7 = arith.constant 0.000000e+00 : f32
    %7 = vector.broadcast %cst_7 : f32 to vector<256x4xf32>
    %8 = arith.maximumf %6, %7 : vector<256x4xf32>
    %9 = arith.truncf %8 : vector<256x4xf32> to vector<256x4xbf16>
    %10 = vector.shape_cast %9 : vector<256x4xbf16> to vector<16x16x4xbf16>
    %cst_8 = arith.constant 0.000000e+00 : bf16
    %11 = vector.broadcast %cst_8 : bf16 to vector<16x1x4xbf16>
    %12 = tpu.concatenate %11, %10, %11 in 1 : vector<16x1x4xbf16>, vector<16x16x4xbf16>, vector<16x1x4xbf16> -> vector<16x18x4xbf16>
    %c1 = arith.constant 1 : index
    %c0_9 = arith.constant 0 : index
    %c0_10 = arith.constant 0 : index
    %13 = vector.load %arg12[%c1, %c0_9, %c0_10] : memref<18x18x4xbf16, #tpu.memory_space<vmem>>, vector<16x18x4xbf16>
    tpu.vector_store %arg12[%c1, %c0_9, %c0_10], %12 {strides = array<i32>} : memref<18x18x4xbf16, #tpu.memory_space<vmem>>, vector<16x18x4xbf16>,
    %cst_11 = arith.constant 0.000000e+00 : bf16
    %14 = vector.broadcast %cst_11 : bf16 to vector<1x18x4xbf16>
    %c0_12 = arith.constant 0 : index
    %c0_13 = arith.constant 0 : index
    %c0_14 = arith.constant 0 : index
    %15 = vector.load %arg12[%c0_12, %c0_13, %c0_14] : memref<18x18x4xbf16, #tpu.memory_space<vmem>>, vector<1x18x4xbf16>
    tpu.vector_store %arg12[%c0_12, %c0_13, %c0_14], %14 {strides = array<i32>} : memref<18x18x4xbf16, #tpu.memory_space<vmem>>, vector<1x18x4xbf16>,
    %c17 = arith.constant 17 : index
    %c0_15 = arith.constant 0 : index
    %c0_16 = arith.constant 0 : index
    %16 = vector.load %arg12[%c17, %c0_15, %c0_16] : memref<18x18x4xbf16, #tpu.memory_space<vmem>>, vector<1x18x4xbf16>
    tpu.vector_store %arg12[%c17, %c0_15, %c0_16], %14 {strides = array<i32>} : memref<18x18x4xbf16, #tpu.memory_space<vmem>>, vector<1x18x4xbf16>,
    %c0_17 = arith.constant 0 : index
    %c0_18 = arith.constant 0 : index
    %c0_19 = arith.constant 0 : index
    %17 = vector.load %arg12[%c0_17, %c0_18, %c0_19] : memref<18x18x4xbf16, #tpu.memory_space<vmem>>, vector<16x18x4xbf16>
    %18 = vector.extract_strided_slice %17 {offsets = [0, 0, 0], sizes = [16, 16, 4], strides = [1, 1, 1]} : vector<16x18x4xbf16> to vector<16x16x4xbf16>
    %19 = vector.extract_strided_slice %17 {offsets = [0, 1, 0], sizes = [16, 16, 4], strides = [1, 1, 1]} : vector<16x18x4xbf16> to vector<16x16x4xbf16>
    %20 = vector.extract_strided_slice %17 {offsets = [0, 2, 0], sizes = [16, 16, 4], strides = [1, 1, 1]} : vector<16x18x4xbf16> to vector<16x16x4xbf16>
    %c1_20 = arith.constant 1 : index
    %c0_21 = arith.constant 0 : index
    %c0_22 = arith.constant 0 : index
    %21 = vector.load %arg12[%c1_20, %c0_21, %c0_22] : memref<18x18x4xbf16, #tpu.memory_space<vmem>>, vector<16x18x4xbf16>
    %22 = vector.extract_strided_slice %21 {offsets = [0, 0, 0], sizes = [16, 16, 4], strides = [1, 1, 1]} : vector<16x18x4xbf16> to vector<16x16x4xbf16>
    %23 = vector.extract_strided_slice %21 {offsets = [0, 1, 0], sizes = [16, 16, 4], strides = [1, 1, 1]} : vector<16x18x4xbf16> to vector<16x16x4xbf16>
    %24 = vector.extract_strided_slice %21 {offsets = [0, 2, 0], sizes = [16, 16, 4], strides = [1, 1, 1]} : vector<16x18x4xbf16> to vector<16x16x4xbf16>
    %c2 = arith.constant 2 : index
    %c0_23 = arith.constant 0 : index
    %c0_24 = arith.constant 0 : index
    %25 = vector.load %arg12[%c2, %c0_23, %c0_24] : memref<18x18x4xbf16, #tpu.memory_space<vmem>>, vector<16x18x4xbf16>
    %26 = vector.extract_strided_slice %25 {offsets = [0, 0, 0], sizes = [16, 16, 4], strides = [1, 1, 1]} : vector<16x18x4xbf16> to vector<16x16x4xbf16>
    %27 = vector.extract_strided_slice %25 {offsets = [0, 1, 0], sizes = [16, 16, 4], strides = [1, 1, 1]} : vector<16x18x4xbf16> to vector<16x16x4xbf16>
    %28 = vector.extract_strided_slice %25 {offsets = [0, 2, 0], sizes = [16, 16, 4], strides = [1, 1, 1]} : vector<16x18x4xbf16> to vector<16x16x4xbf16>
    %29 = tpu.concatenate %18, %19, %20, %22, %23, %24, %26, %27, %28 in 2 : vector<16x16x4xbf16>, vector<16x16x4xbf16>, vector<16x16x4xbf16>, vector<16x16x4xbf16>, vector<16x16x4xbf16>, vector<16x16x4xbf16>, vector<16x16x4xbf16>, vector<16x16x4xbf16>, vector<16x16x4xbf16> -> vector<16x16x36xbf16>
    %30 = vector.shape_cast %29 : vector<16x16x36xbf16> to vector<256x36xbf16>
    %c0_25 = arith.constant 0 : index
    %c0_26 = arith.constant 0 : index
    %31 = vector.load %arg4[%c0_25, %c0_26] : memref<36x4xbf16, #tpu.memory_space<vmem>>, vector<36x4xbf16>
    %cst_27 = arith.constant dense<0.000000e+00> : vector<256x4xf32>
    %32 = tpu.matmul %30, %31, %cst_27 {dimension_numbers = #tpu.dot_dimension_numbers<[1], [0], [0], [1], [0, 0, 1, 1], [], []>} : vector<256x36xbf16>, vector<36x4xbf16>, vector<256x4xf32> -> vector<256x4xf32>
    %c0_28 = arith.constant 0 : index
    %c0_29 = arith.constant 0 : index
    %33 = vector.load %arg5[%c0_28, %c0_29] : memref<1x4xf32, #tpu.memory_space<vmem>>, vector<1x4xf32>
    %34 = vector.broadcast %33 : vector<1x4xf32> to vector<256x4xf32>
    %35 = arith.addf %32, %34 : vector<256x4xf32>
    %cst_30 = arith.constant 0.000000e+00 : f32
    %36 = vector.broadcast %cst_30 : f32 to vector<256x4xf32>
    %37 = arith.maximumf %35, %36 : vector<256x4xf32>
    %38 = vector.shape_cast %37 : vector<256x4xf32> to vector<8x2x16x4xf32>
    %39 = vector.extract_strided_slice %38 {offsets = [0, 0, 0, 0], sizes = [8, 1, 16, 4], strides = [1, 1, 1, 1]} : vector<8x2x16x4xf32> to vector<8x1x16x4xf32>
    %40 = vector.shape_cast %39 : vector<8x1x16x4xf32> to vector<8x16x4xf32>
    %41 = vector.extract_strided_slice %38 {offsets = [0, 1, 0, 0], sizes = [8, 1, 16, 4], strides = [1, 1, 1, 1]} : vector<8x2x16x4xf32> to vector<8x1x16x4xf32>
    %42 = vector.shape_cast %41 : vector<8x1x16x4xf32> to vector<8x16x4xf32>
    %43 = arith.addf %40, %42 : vector<8x16x4xf32>
    %c0_31 = arith.constant 0 : index
    %c0_32 = arith.constant 0 : index
    %c0_33 = arith.constant 0 : index
    %44 = vector.load %arg13[%c0_31, %c0_32, %c0_33] : memref<8x16x4xf32, #tpu.memory_space<vmem>>, vector<8x16x4xf32>
    tpu.vector_store %arg13[%c0_31, %c0_32, %c0_33], %43 {strides = array<i32>} : memref<8x16x4xf32, #tpu.memory_space<vmem>>, vector<8x16x4xf32>,
    %c0_34 = arith.constant 0 : index
    %c0_35 = arith.constant 0 : index
    %c0_36 = arith.constant 0 : index
    %45 = tpu.strided_load %arg13[%c0_34, %c0_35, %c0_36] {strides = array<i32: 1, 2, 1>} : memref<8x16x4xf32, #tpu.memory_space<vmem>>, vector<8x8x4xf32>
    %c0_37 = arith.constant 0 : index
    %c1_38 = arith.constant 1 : index
    %c0_39 = arith.constant 0 : index
    %46 = tpu.strided_load %arg13[%c0_37, %c1_38, %c0_39] {strides = array<i32: 1, 2, 1>} : memref<8x16x4xf32, #tpu.memory_space<vmem>>, vector<8x8x4xf32>
    %47 = arith.addf %45, %46 : vector<8x8x4xf32>
    %cst_40 = arith.constant 2.500000e-01 : f32
    %48 = vector.broadcast %cst_40 : f32 to vector<8x8x4xf32>
    %49 = arith.mulf %47, %48 : vector<8x8x4xf32>
    %50 = vector.shape_cast %49 : vector<8x8x4xf32> to vector<64x4xf32>
    %51 = arith.truncf %50 : vector<64x4xf32> to vector<64x4xbf16>
    %c0_41 = arith.constant 0 : index
    %c0_42 = arith.constant 0 : index
    %52 = vector.load %arg6[%c0_41, %c0_42] : memref<4x16xbf16, #tpu.memory_space<vmem>>, vector<4x16xbf16>
    %cst_43 = arith.constant dense<0.000000e+00> : vector<64x16xf32>
    %53 = tpu.matmul %51, %52, %cst_43 {dimension_numbers = #tpu.dot_dimension_numbers<[1], [0], [0], [1], [0, 0, 1, 1], [], []>} : vector<64x4xbf16>, vector<4x16xbf16>, vector<64x16xf32> -> vector<64x16xf32>
    %c0_44 = arith.constant 0 : index
    %c0_45 = arith.constant 0 : index
    %54 = vector.load %arg7[%c0_44, %c0_45] : memref<1x16xf32, #tpu.memory_space<vmem>>, vector<1x16xf32>
    %55 = vector.broadcast %54 : vector<1x16xf32> to vector<64x16xf32>
    %56 = arith.addf %53, %55 : vector<64x16xf32>
    %c0_46 = arith.constant 0 : index
    %c0_47 = arith.constant 0 : index
    %c0_48 = arith.constant 0 : index
    %c0_49 = arith.constant 0 : index
    %57 = vector.load %arg10[%c0_46, %c0_47, %c0_48, %c0_49] : memref<1x8x8x8xbf16, #tpu.memory_space<vmem>>, vector<1x8x8x8xbf16>
    %58 = vector.shape_cast %57 : vector<1x8x8x8xbf16> to vector<64x8xbf16>
    %c0_50 = arith.constant 0 : index
    %c0_51 = arith.constant 0 : index
    %59 = vector.load %arg8[%c0_50, %c0_51] : memref<8x16xbf16, #tpu.memory_space<vmem>>, vector<8x16xbf16>
    %cst_52 = arith.constant dense<0.000000e+00> : vector<64x16xf32>
    %60 = tpu.matmul %58, %59, %cst_52 {dimension_numbers = #tpu.dot_dimension_numbers<[1], [0], [0], [1], [0, 0, 1, 1], [], []>} : vector<64x8xbf16>, vector<8x16xbf16>, vector<64x16xf32> -> vector<64x16xf32>
    %c0_53 = arith.constant 0 : index
    %c0_54 = arith.constant 0 : index
    %61 = vector.load %arg9[%c0_53, %c0_54] : memref<1x16xf32, #tpu.memory_space<vmem>>, vector<1x16xf32>
    %62 = vector.broadcast %61 : vector<1x16xf32> to vector<64x16xf32>
    %63 = arith.addf %60, %62 : vector<64x16xf32>
    %64 = arith.addf %56, %63 : vector<64x16xf32>
    %cst_55 = arith.constant 0.000000e+00 : f32
    %65 = vector.broadcast %cst_55 : f32 to vector<64x16xf32>
    %66 = arith.maximumf %64, %65 : vector<64x16xf32>
    %67 = vector.shape_cast %66 : vector<64x16xf32> to vector<1x8x8x16xf32>
    %c0_56 = arith.constant 0 : index
    %c0_57 = arith.constant 0 : index
    %c0_58 = arith.constant 0 : index
    %c0_59 = arith.constant 0 : index
    %68 = vector.load %arg11[%c0_56, %c0_57, %c0_58, %c0_59] : memref<1x8x8x16xf32, #tpu.memory_space<vmem>>, vector<1x8x8x16xf32>
    tpu.vector_store %arg11[%c0_56, %c0_57, %c0_58, %c0_59], %67 {strides = array<i32>} : memref<1x8x8x16xf32, #tpu.memory_space<vmem>>, vector<1x8x8x16xf32>,
    return
  }
  func.func @transform_0(%arg0: i32) -> (i32, i32, i32, i32) {
    %c0_i32 = arith.constant 0 : i32
    %c0_i32_0 = arith.constant 0 : i32
    %c0_i32_1 = arith.constant 0 : i32
    %c0_i32_2 = arith.constant 0 : i32
    return %arg0, %c0_i32, %c0_i32_0, %c0_i32_1 : i32, i32, i32, i32
  }
  func.func @transform_1(%arg0: i32) -> (i32, i32) {
    %c0_i32 = arith.constant 0 : i32
    %c0_i32_0 = arith.constant 0 : i32
    %c0_i32_1 = arith.constant 0 : i32
    return %c0_i32, %c0_i32_0 : i32, i32
  }
  func.func @transform_2(%arg0: i32) -> (i32, i32) {
    %c0_i32 = arith.constant 0 : i32
    %c0_i32_0 = arith.constant 0 : i32
    %c0_i32_1 = arith.constant 0 : i32
    return %c0_i32, %c0_i32_0 : i32, i32
  }
  func.func @transform_3(%arg0: i32) -> (i32, i32) {
    %c0_i32 = arith.constant 0 : i32
    %c0_i32_0 = arith.constant 0 : i32
    %c0_i32_1 = arith.constant 0 : i32
    return %c0_i32, %c0_i32_0 : i32, i32
  }
  func.func @transform_4(%arg0: i32) -> (i32, i32) {
    %c0_i32 = arith.constant 0 : i32
    %c0_i32_0 = arith.constant 0 : i32
    %c0_i32_1 = arith.constant 0 : i32
    return %c0_i32, %c0_i32_0 : i32, i32
  }
  func.func @transform_5(%arg0: i32) -> (i32, i32) {
    %c0_i32 = arith.constant 0 : i32
    %c0_i32_0 = arith.constant 0 : i32
    %c0_i32_1 = arith.constant 0 : i32
    return %c0_i32, %c0_i32_0 : i32, i32
  }
  func.func @transform_6(%arg0: i32) -> (i32, i32) {
    %c0_i32 = arith.constant 0 : i32
    %c0_i32_0 = arith.constant 0 : i32
    %c0_i32_1 = arith.constant 0 : i32
    return %c0_i32, %c0_i32_0 : i32, i32
  }
  func.func @transform_7(%arg0: i32) -> (i32, i32) {
    %c0_i32 = arith.constant 0 : i32
    %c0_i32_0 = arith.constant 0 : i32
    %c0_i32_1 = arith.constant 0 : i32
    return %c0_i32, %c0_i32_0 : i32, i32
  }
  func.func @transform_8(%arg0: i32) -> (i32, i32) {
    %c0_i32 = arith.constant 0 : i32
    %c0_i32_0 = arith.constant 0 : i32
    %c0_i32_1 = arith.constant 0 : i32
    return %c0_i32, %c0_i32_0 : i32, i32
  }
  func.func @transform_9(%arg0: i32) -> (i32, i32, i32, i32) {
    %c0_i32 = arith.constant 0 : i32
    %c0_i32_0 = arith.constant 0 : i32
    %c0_i32_1 = arith.constant 0 : i32
    %c0_i32_2 = arith.constant 0 : i32
    return %arg0, %c0_i32, %c0_i32_0, %c0_i32_1 : i32, i32, i32, i32
  }
  func.func @transform_10(%arg0: i32) -> (i32, i32, i32, i32) {
    %c0_i32 = arith.constant 0 : i32
    %c0_i32_0 = arith.constant 0 : i32
    %c0_i32_1 = arith.constant 0 : i32
    %c0_i32_2 = arith.constant 0 : i32
    return %arg0, %c0_i32, %c0_i32_0, %c0_i32_1 : i32, i32, i32, i32
  }
}

</mosaic_0001>

<bundles_post_ra>
// kernel: tpu_custom_call.1
= control target key start
LH: loop header
LB: loop body
LE: loop exit
PB: predicated region body
PF: predicated region fallthrough
CT: control target
= control target key end

     0   :  { %15 = vsyncpa [#allocation5], 0  ;;  %s5688_s0 = inlined_call_operand.vmem [shape: bf16[2,16,16,8], index: 0, kind: input, shape index: {}]   ;;  %s5689_s1 = inlined_call_operand.vmem [shape: bf16[8,4], index: 1, kind: input, shape index: {}]   ;;  %s5690_s2 = inlined_call_operand.vmem [shape: f32[1,4], index: 2, kind: input, shape index: {}]   ;;  %s5691_s3 = inlined_call_operand.vmem [shape: bf16[36,4], index: 3, kind: input, shape index: {}]   ;;  %s5692_s4 = inlined_call_operand.vmem [shape: f32[1,4], index: 4, kind: input, shape index: {}]   ;;  %s5693_s5 = inlined_call_operand.vmem [shape: bf16[4,16], index: 5, kind: input, shape index: {}]   ;;  %s5694_s6 = inlined_call_operand.vmem [shape: f32[1,16], index: 6, kind: input, shape index: {}]   ;;  %s5695_s7 = inlined_call_operand.vmem [shape: bf16[8,16], index: 7, kind: input, shape index: {}]   ;;  %s5696_s8 = inlined_call_operand.vmem [shape: f32[1,16], index: 8, kind: input, shape index: {}]   ;;  %s5697_s9 = inlined_call_operand.vmem [shape: bf16[2,8,8,8], index: 9, kind: input, shape index: {}]   ;;  %s5698_s10 = inlined_call_operand.hbm [shape: f32[2,8,8,16], index: 10, kind: output, shape index: {}]  }
   0x1   :  { %17 = vsyncpa [#allocation5 + $0x1], 0  ;;  %s4307_s13 = smov 0   ;;  %s4309_s14 = smov 0  }
   0x2   :  { %s4311_s15 = smov 0   ;;  %s4313_s16 = smov 0  }
   0x3 LB: > { %s4328_s17 = sadd.s32 4294967295, %s4239_s16   ;;  %s3600_s18 = sadd.s32 4294967294, %s4239_s16   ;;  %s4239_s16 = sphi %s4313_s16, %s5710_s16   ;;  %s4235_s15 = sphi %s4311_s15, %s5709_s15   ;;  %s4231_s14 = sphi %s4309_s14, %s5708_s14   ;;  %s4227_s13 = sphi %s4307_s13, %s5707_s13  }
   0x4   : > { %s4332_s19 = sadd.s32 1, %s4239_s16   ;;  %s250_s20 = sadd.s32 1, %s4235_s15 }
   0x5   : > { %s247_s21 = ssub.s32 %s4239_s16, %s4332_s19  ;;  %p260_p0 = scmp.ne.s32.totalorder %s4235_s15, %s4231_s14 }
   0x6   : > { %p248_p1 = scmp.eq.s32.totalorder %s247_s21, 0  ;;  %p261_p2 = scmp.eq.s32.totalorder %s4328_s17, 1 }
   0x7   : > { %p266_p3 = scmp.ne.s32.totalorder %s4231_s14, %s4227_s13  ;;  %p267_p4 = scmp.eq.s32.totalorder %s3600_s18, 1 }
   0x8   : > { %s4343_s22 = scalar_select %p248_p1, %s4235_s15, %s250_s20  }
   0x9   : > { %p4345_p5 = por %p261_p2, %p260_p0  ;;  %p4349_p6 = por %p267_p4, %p266_p3 }
   0xa   : > { %p3603_p7 = scmp.ge.s32.totalorder %s4239_s16, 1  ;;  %p325_p8 = scmp.lt.s32.totalorder %s4239_s16, 3 }
   0xc   : > { %p326_p9 = pnand %p3603_p7, %p325_p8 }
   0xe   : > { %329 = sbr.rel (%p326_p9) target bundleno = 1116 (0x45c), region = 60 }
  0x15   : > { %v411_v0 = vld [vmem:[%s5689_s1] sm:$0xf]  ;;  %vm548_vm0 = vcmask 1043456   ;;  %p368_p10 = scmp.lt.s32.totalorder %s4328_s17, 1  ;;  %vm499_vm1 = vcmask 64512   ;;  %vm1117_vm2 = vcmask 27648  }
  0x16   : > { %3992 = vmatprep.subr.msk.bf16.mxu0 %vm548_vm0, %v411_v0  ;;  %3993 = vmatprep.subr.msk.bf16.mxu1 %vm548_vm0, %v411_v0  ;;  %v550_v1 = vsel %vm548_vm0, %v411_v0, 0  ;;  %vm1120_vm3 = vcmask 24576   ;;  %v4241_v18 = vmov 0   ;;  %vm1672_vm4 = vcmask 1046528   ;;  %s4242_s12 = smov 8   ;;  %s4243_s18 = smov 4  }
  0x17   : > { %3875 = vmatpush3.bf16.msra.mxu0 %v550_v1  ;;  %3967 = vmatpush3.bf16.msra.mxu1 %v550_v1  ;;  %s4363_s27 = scalar_select %p368_p10, %s4328_s17, 1  ;;  %1167 = vst.msk [vmem:[#allocation2] sm:$0xf] %vm1117_vm2, %v4241_v18  ;;  %1168 = vst.msk [vmem:[#allocation2 + $0x4] sm:$0xf] %vm1117_vm2, %v4241_v18  ;;  %vm905_vm6 = vcmask 1040384  }
  0x18   : > { %1169 = vst.msk [vmem:[#allocation2 + $0x8] sm:$0x1] %vm1120_vm3, %v4241_v18  ;;  %1173 = vst.msk [vmem:[#allocation2 + $0xd4] sm:$0x1] %vm1120_vm3, %v4241_v18  ;;  %vm1447_vm5 = vsmask.f32 7424 }
  0x19   : > { %s3825_s28 = sshll.u32 %s4363_s27, 7  ;;  %1171 = vst.msk [vmem:[#allocation2 + $0xcc] sm:$0xf] %vm1117_vm2, %v4241_v18  ;;  %1172 = vst.msk [vmem:[#allocation2 + $0xd0] sm:$0xf] %vm1117_vm2, %v4241_v18  ;;  %s4244_s25 = smov 24  }
  0x1a   : > { %s4369_s11 = scalar_lea.vmem %s5688_s0, %s3825_s28  ;;  %v4416_v31 = vld [vmem:[%s5690_s2] ss:$0 sm:$0xff]  ;;  %vm906_vm7 = vsmask.f32 256  ;;  %s4245_s26 = smov 12   ;;  %vm3004_vm9 = vcmask 1041408  }
  0x1b   : > { %v4046_v2 = vld [vmem:[%s4369_s11] sm:$0xff]   ;;  %v4048_v4 = vld [vmem:[%s4369_s11 + $0x8] sm:$0xff]   ;;  %v4050_v6 = vld [vmem:[%s4369_s11 + $0x10] sm:$0xff]   ;;  %s4246_s28 = smov 20   ;;  %s4247_s29 = smov 32   ;;  %vm2681_vm10 = vcmask 31744  }
  0x1c   : > { %v4047_v3 = vld [vmem:[%s4369_s11 + $0x60] sm:$0xff]   ;;  %3876 = vmatprep.mubr.msk.bf16.mxu0 %vm499_vm1, %v4046_v2  ;;  %v4049_v5 = vld [vmem:[%s4369_s11 + $0x68] sm:$0xff]   ;;  %v4052_v7 = vld [vmem:[%s4369_s11 + $0x70] sm:$0xff]   ;;  %s4248_s30 = smov 16   ;;  %vm2746_vm11 = vcmask 97280   ;;  %vm2779_vm12 = vcmask 130048  }
  0x1d   : > { %3900 = vmatprep.mubr.msk.bf16.mxu1 %vm499_vm1, %v4047_v3  ;;  %3877 = vmatmul.mubr.msk.bf16.vlgmr.msra.gmra.mrb[0].mxu0 %vm499_vm1, %v4048_v4  ;;  %v4051_v8 = vld [vmem:[%s4369_s11 + $0x18] sm:$0xff]   ;;  %v4054_v10 = vld [vmem:[%s4369_s11 + $0x20] sm:$0xff]   ;;  %v4055_v11 = vld [vmem:[%s4369_s11 + $0x28] sm:$0xff]   ;;  %vm2812_vm13 = vcmask 162816   ;;  %vm2845_vm14 = vcmask 195584   ;;  %vm2878_vm15 = vcmask 228352  }
  0x1e   : > { %3901 = vmatmul.mubr.msk.bf16.vlgmr.msra.gmra.mrb[0].mxu1 %vm499_vm1, %v4049_v5  ;;  %3880 = vmatprep.mubr.msk.bf16.mxu0 %vm499_vm1, %v4050_v6  ;;  %v4053_v9 = vld [vmem:[%s4369_s11 + $0x78] sm:$0xff]   ;;  %v4056_v12 = vld [vmem:[%s4369_s11 + $0x30] sm:$0xff]   ;;  %v4058_v14 = vld [vmem:[%s4369_s11 + $0x40] sm:$0xff]   ;;  %s3827_s20 = sshll.u32 %s4328_s17, 10 }
  0x1f   : > { %3904 = vmatprep.mubr.msk.bf16.mxu1 %vm499_vm1, %v4052_v7  ;;  %v4057_v13 = vld [vmem:[%s4369_s11 + $0x38] sm:$0xff]   ;;  %v4059_v15 = vld [vmem:[%s4369_s11 + $0x48] sm:$0xff]   ;;  %v4060_v16 = vld [vmem:[%s4369_s11 + $0x50] sm:$0xff]  }
  0x20   : > { %v4061_v17 = vld [vmem:[%s4369_s11 + $0x58] sm:$0xff]   ;;  %v4062_v19 = vld [vmem:[#allocation2] sm:$0xff]   ;;  %v4063_v20 = vld [vmem:[#allocation2 + $0x8] ss:$0 sps:$4 sm:$0x11]   ;;  %s4249_s11 = smov 28  }
  0x21   : > { %v1451_v21 = vshll.u32 %v4062_v19, 16  ;;  %v1673_v22 = vrot.slane %v4062_v19, 1  ;;  %v1674_v23 = vrot.slane %v4063_v20, 1  ;;  %v1449_v24 = vshrl.u32 %v4062_v19, 16  ;;  %vm4429_vm8 = vmand %vm905_vm6, %vm906_vm7 }
  0x22   : > { %v1456_v26 = vshll.u32 %v4063_v20, 16 }
  0x23   : > { %v1453_v25 = vrot.slane %v1451_v21, 1  ;;  %v1675_v27 = vsel %vm1672_vm4, %v1673_v22, %v1674_v23 }
  0x24   : > { %1721 = vrot.lane.b32.xlu1 %v1675_v27, %s4242_s12  ;;  %v1458_v29 = vrot.slane %v1456_v26, 1 }
  0x25   : > { %3881 = vmatmul.mubr.msk.bf16.gmra.mrb[4].mxu0 %vm499_vm1, %v4051_v8  ;;  %v1454_v28 = vor.u32 %v1453_v25, %v1449_v24 }
  0x26   : > { %3905 = vmatmul.mubr.msk.bf16.gmra.mrb[4].mxu1 %vm499_vm1, %v4053_v9  ;;  %3884 = vmatprep.mubr.msk.bf16.mxu0 %vm499_vm1, %v4054_v10 }
  0x27   : > { %v1459_v30 = vsel %vm1447_vm5, %v1454_v28, %v1458_v29 }
  0x28   : > { %1640 = vrot.lane.b32.xlu0 %v1459_v30, %s4243_s18 }
  0x2d   : > { %3885 = vmatmul.mubr.msk.bf16.gmra.mrb[8].mxu0 %vm499_vm1, %v4055_v11 }
  0x2e   : > { %3888 = vmatprep.mubr.msk.bf16.mxu0 %vm499_vm1, %v4056_v12 }
  0x35   : > { %3889 = vmatmul.mubr.msk.bf16.gmra.mrb[12].mxu0 %vm499_vm1, %v4057_v13 }
  0x36   : > { %3892 = vmatprep.mubr.msk.bf16.mxu0 %vm499_vm1, %v4058_v14 }
  0x3d   : > { %3893 = vmatmul.mubr.msk.bf16.gmra.mrb[16].mxu0 %vm499_vm1, %v4059_v15 }
  0x3e   : > { %3896 = vmatprep.mubr.msk.bf16.mxu0 %vm499_vm1, %v4060_v16 }
  0x45   : > { %3897 = vmatmul.mubr.msk.bf16.gmra.mrb[20].mxu0 %vm499_vm1, %v4061_v17 }
  0xf0   : > { %v3878_v32 = vpop.f32.mrb[0].mxu0 }
  0xf1   : > { %v595_v33 = vadd.f32 %v3878_v32, %v4416_v31  ;;  %v3902_v34 = vpop.f32.mrb[0].mxu1  ;;  %v586_v35 = vpop.f32.mrb[1].mxu0 }
  0xf2   : > { %v691_v36 = vadd.f32 %v3902_v34, %v4416_v31  ;;  %v587_v37 = vadd.f32 %v4416_v31, %v586_v35  ;;  %v682_v38 = vpop.f32.mrb[1].mxu1  ;;  %v3879_v39 = vpop.f32.mrb[2].mxu0 }
  0xf3   : > { %v683_v40 = vadd.f32 %v4416_v31, %v682_v38  ;;  %v598_v41 = vadd.f32 %v3879_v39, %v4416_v31  ;;  %v3903_v42 = vpop.f32.mrb[2].mxu1  ;;  %v589_v43 = vpop.f32.mrb[3].mxu0  ;;  %v715_v48 = vmax.f32 %v595_v33, 0.0 }
  0xf4   : > { %v739_v44 = vmax.f32 %v691_v36, 0.0  ;;  %v694_v45 = vadd.f32 %v3903_v42, %v4416_v31  ;;  %v590_v46 = vadd.f32 %v4416_v31, %v589_v43  ;;  %v685_v47 = vpop.f32.mrb[3].mxu1  ;;  %v713_v52 = vmax.f32 %v587_v37, 0.0 }
  0xf5   : > { %v737_v49 = vmax.f32 %v683_v40, 0.0  ;;  %v716_v50 = vmax.f32 %v598_v41, 0.0  ;;  %v686_v51 = vadd.f32 %v4416_v31, %v685_v47 }
  0xf6   : > { %v740_v53 = vmax.f32 %v694_v45, 0.0  ;;  %v714_v54 = vmax.f32 %v590_v46, 0.0 }
  0xf7   : > { %v746_v55 = vpack.c.bf16 %v716_v50, %v715_v48  ;;  %v738_v56 = vmax.f32 %v686_v51, 0.0 }
  0xf8   : > { %v758_v57 = vpack.c.bf16 %v740_v53, %v739_v44  ;;  %v745_v58 = vpack.c.bf16 %v714_v54, %v713_v52  ;;  %v3882_v59 = vpop.f32.mrb[4].mxu0 }
  0xf9   : > { %v769_v60 = vshrl.u32 %v746_v55, 16  ;;  %v772_v61 = vshll.u32 %v746_v55, 16  ;;  %v757_v62 = vpack.c.bf16 %v738_v56, %v737_v49  ;;  %v4427_v63 = vadd.f32 %v3882_v59, %v4416_v31  ;;  %v602_v0 = vpop.f32.mrb[5].mxu0  ;;  %v3906_v1 = vpop.f32.mrb[4].mxu1 }
  0xfa   : > { %v853_v3 = vshrl.u32 %v758_v57, 16  ;;  %v856_v4 = vshll.u32 %v758_v57, 16  ;;  %v762_v5 = vshrl.u32 %v745_v58, 16  ;;  %v765_v6 = vshll.u32 %v745_v58, 16  ;;  %v3883_v7 = vpop.f32.mrb[6].mxu0  ;;  %v4433_v8 = vpop.f32.mrb[5].mxu1 }
  0xfb   : > { %v771_v9 = vrot.slane %v769_v60, 7  ;;  %v846_v10 = vshrl.u32 %v757_v62, 16  ;;  %v849_v11 = vshll.u32 %v757_v62, 16  ;;  %v719_v12 = vmax.f32 %v4427_v63, 0.0  ;;  %v605_v13 = vpop.f32.mrb[7].mxu0  ;;  %v3907_v14 = vpop.f32.mrb[6].mxu1 }
  0xfc   : > { %v855_v15 = vrot.slane %v853_v3, 7  ;;  %v764_v16 = vrot.slane %v762_v5, 7  ;;  %v603_v17 = vadd.f32 %v4416_v31, %v602_v0  ;;  %v614_v18 = vadd.f32 %v3883_v7, %v4416_v31  ;;  %v4438_v19 = vpop.f32.mrb[7].mxu1 }
  0xfd   : > { %v774_v20 = vor.u32 %v772_v61, %v771_v9  ;;  %v925_v21 = vsel %vm4429_vm8, %v771_v9, 0  ;;  %v848_v22 = vrot.slane %v846_v10, 7  ;;  %v606_v23 = vadd.f32 %v4416_v31, %v605_v13 }
  0xfe   : > { %v3647_v24 = vcombine.low %v925_v21, %v925_v21  ;;  %v858_v25 = vor.u32 %v856_v4, %v855_v15  ;;  %v937_v26 = vsel %vm4429_vm8, %v855_v15, 0  ;;  %v767_v27 = vor.u32 %v765_v6, %v764_v16 }
  0xff   : > { %v909_v28 = vsel %vm4429_vm8, 0, %v774_v20  ;;  %v3683_v29 = vcombine.low %v937_v26, %v937_v26  ;;  %v924_v30 = vsel %vm4429_vm8, %v764_v16, 0  ;;  %v851_v32 = vor.u32 %v849_v11, %v848_v22 }
 0x100   : > { %v3645_v33 = vcombine.low %v909_v28, %v909_v28  ;;  %v3646_v34 = vcombine.high %v909_v28, %v909_v28  ;;  %1124 = vst.msk [vmem:[#allocation2 + $0x20] sm:$0x1] %vm1120_vm3, %v3647_v24  ;;  %v921_v35 = vsel %vm4429_vm8, 0, %v858_v25  ;;  %v908_v36 = vsel %vm4429_vm8, 0, %v767_v27  ;;  %v4454_v37 = vpop.f32.mrb[8].mxu0 }
 0x101   : > { %v3681_v38 = vcombine.low %v921_v35, %v921_v35  ;;  %v3682_v39 = vcombine.high %v921_v35, %v921_v35  ;;  %1160 = vst.msk [vmem:[#allocation2 + $0xb0] sm:$0x1] %vm1120_vm3, %v3683_v29  ;;  %v3642_v40 = vcombine.low %v908_v36, %v908_v36  ;;  %v3643_v41 = vcombine.high %v908_v36, %v908_v36  ;;  %v4457_v42 = vpop.f32.mrb[9].mxu0 }
 0x102   : > { %1122 = vst.msk [vmem:[#allocation2 + $0x18] sm:$0xf] %vm1117_vm2, %v3645_v33  ;;  %1123 = vst.msk [vmem:[#allocation2 + $0x1c] sm:$0xf] %vm1117_vm2, %v3646_v34  ;;  %v3644_v43 = vcombine.low %v924_v30, %v924_v30  ;;  %v920_v44 = vsel %vm4429_vm8, 0, %v851_v32  ;;  %v936_v45 = vsel %vm4429_vm8, %v848_v22, 0  ;;  %v707_v54 = vadd.f32 %v3906_v1, %v4416_v31 }
 0x103   : > { %v717_v46 = vmax.f32 %v603_v17, 0.0  ;;  %v4465_v47 = vpop.f32.mrb[10].mxu0  ;;  %1158 = vst.msk [vmem:[#allocation2 + $0xa8] sm:$0xf] %vm1117_vm2, %v3681_v38  ;;  %1159 = vst.msk [vmem:[#allocation2 + $0xac] sm:$0xf] %vm1117_vm2, %v3682_v39  ;;  %v3678_v48 = vcombine.low %v920_v44, %v920_v44  ;;  %v3679_v49 = vcombine.high %v920_v44, %v920_v44  ;;  %v3680_v50 = vcombine.low %v936_v45, %v936_v45 }
 0x104   : > { %1118 = vst.msk [vmem:[#allocation2 + $0xc] sm:$0xf] %vm1117_vm2, %v3642_v40  ;;  %1119 = vst.msk [vmem:[#allocation2 + $0x10] sm:$0xf] %vm1117_vm2, %v3643_v41  ;;  %v720_v51 = vmax.f32 %v614_v18, 0.0  ;;  %v4471_v52 = vpop.f32.mrb[11].mxu0  ;;  %v710_v55 = vadd.f32 %v3907_v14, %v4416_v31  ;;  %v4493_v9 = vadd.f32 %v4416_v31, %v4433_v8  ;;  %v702_v40 = vadd.f32 %v4416_v31, %v4438_v19 }
 0x105   : > { %1121 = vst.msk [vmem:[#allocation2 + $0x14] sm:$0x1] %vm1120_vm3, %v3644_v43  ;;  %v718_v53 = vmax.f32 %v606_v23, 0.0  ;;  %1157 = vst.msk [vmem:[#allocation2 + $0xa4] sm:$0x1] %vm1120_vm3, %v3680_v50  ;;  %v743_v58 = vmax.f32 %v707_v54, 0.0 }
 0x106   : > { %1155 = vst.msk [vmem:[#allocation2 + $0x9c] sm:$0xf] %vm1117_vm2, %v3678_v48  ;;  %1156 = vst.msk [vmem:[#allocation2 + $0xa0] sm:$0xf] %vm1117_vm2, %v3679_v49  ;;  %v748_v56 = vpack.c.bf16 %v720_v51, %v719_v12  ;;  %v744_v59 = vmax.f32 %v710_v55, 0.0  ;;  %v741_v20 = vmax.f32 %v4493_v9, 0.0 }
 0x107   : > { %v747_v57 = vpack.c.bf16 %v718_v53, %v717_v46  ;;  %v4487_v5 = vld [vmem:[#allocation2 + $0x20] ss:$0 sps:$4 sm:$0x11]   ;;  %v742_v53 = vmax.f32 %v702_v40, 0.0 }
 0x108   : > { %v783_v60 = vshrl.u32 %v748_v56, 16  ;;  %v786_v61 = vshll.u32 %v748_v56, 16  ;;  %v4479_v63 = vpack.c.bf16 %v744_v59, %v743_v58  ;;  %v4481_v0 = vpop.f32.mrb[12].mxu0  ;;  %v2141_v21 = vrot.slane %v4487_v5, 1 }
 0x109   : > { %v776_v62 = vshrl.u32 %v747_v57, 16  ;;  %v4483_v1 = vld [vmem:[#allocation2 + $0x18] sm:$0xff]   ;;  %v779_v3 = vshll.u32 %v747_v57, 16  ;;  %v4520_v27 = vld [vmem:[#allocation2 + $0xb0] ss:$0 sps:$4 sm:$0x11]  }
 0x10a   : > { %v4485_v4 = vld [vmem:[#allocation2 + $0x18] sm:$0xff]   ;;  %v785_v6 = vrot.slane %v783_v60, 7  ;;  %2297 = vrot.lane.b32.xlu0 %v4483_v1, %s4244_s25  ;;  %v4497_v11 = vld [vmem:[#allocation2 + $0xa8] sm:$0xff]   ;;  %v4530_v30 = vld [vmem:[#allocation2 + $0x20] ss:$0 sps:$4 sm:$0x11]  }
 0x10b   : > { %v778_v7 = vrot.slane %v776_v62, 7  ;;  %1835 = vrot.lane.b32.xlu1 %v4485_v4, %s4245_s26  ;;  %v4501_v14 = vld [vmem:[#allocation2 + $0xa8] sm:$0xff]   ;;  %v2140_v29 = vrot.slane %v4485_v4, 1  ;;  %v4532_v32 = vld [vmem:[#allocation2 + $0x18] sm:$0xff]   ;;  %v2601_v38 = vrot.slane %v4483_v1, 1  ;;  %v2177_v43 = vrot.slane %v4520_v27, 1 }
 0x10c   : > { %v788_v10 = vor.u32 %v786_v61, %v785_v6  ;;  %v927_v12 = vsel %vm4429_vm8, %v785_v6, 0  ;;  %v4516_v25 = vld [vmem:[#allocation2 + $0xc] sm:$0xff]   ;;  %v2176_v34 = vrot.slane %v4501_v14, 1  ;;  %v4539_v35 = vld [vmem:[#allocation2 + $0x20] ss:$0 sps:$4 sm:$0x11]   ;;  %v759_v61 = vpack.c.bf16 %v742_v53, %v741_v20 }
 0x10d   : > { %v781_v13 = vor.u32 %v779_v3, %v778_v7  ;;  %v3653_v16 = vcombine.low %v927_v12, %v927_v12  ;;  %v926_v22 = vsel %vm4429_vm8, %v778_v7, 0  ;;  %v4522_v28 = vld [vmem:[#allocation2 + $0x9c] sm:$0xff]   ;;  %v4541_v36 = vld [vmem:[#allocation2 + $0xc] sm:$0xff]   ;;  %v4544_v39 = vld [vmem:[#allocation2 + $0x14] ss:$0 sps:$4 sm:$0x11]   ;;  %v2142_v41 = vsel %vm1672_vm4, %v2140_v29, %v2141_v21 }
 0x10e   : > { %v911_v15 = vsel %vm4429_vm8, 0, %v788_v10  ;;  %2321 = vrot.lane.b32.xlu0 %v4497_v11, %s4244_s25  ;;  %v3650_v26 = vcombine.low %v926_v22, %v926_v22  ;;  %v4536_v33 = vld [vmem:[#allocation2 + $0x9c] sm:$0xff]   ;;  %v1679_v44 = vrot.slane %v4532_v32, 1  ;;  %v2602_v45 = vrot.slane %v4530_v30, 1  ;;  %v4577_v9 = vld [vmem:[#allocation2 + $0xa8] sm:$0xff]  }
 0x10f   : > { %v3651_v8 = vcombine.low %v911_v15, %v911_v15  ;;  %v3652_v17 = vcombine.high %v911_v15, %v911_v15  ;;  %v910_v18 = vsel %vm4429_vm8, 0, %v781_v13  ;;  %1859 = vrot.lane.b32.xlu1 %v4501_v14, %s4245_s26  ;;  %1130 = vst.msk [vmem:[#allocation2 + $0x38] sm:$0x1] %vm1120_vm3, %v3653_v16  ;;  %v4555_v46 = vld [vmem:[#allocation2 + $0xb0] ss:$0 sps:$4 sm:$0x11]   ;;  %v2178_v54 = vsel %vm1672_vm4, %v2176_v34, %v2177_v43 }
 0x110   : > { %v3648_v23 = vcombine.low %v910_v18, %v910_v18  ;;  %v3649_v24 = vcombine.high %v910_v18, %v910_v18  ;;  %1127 = vst.msk [vmem:[#allocation2 + $0x2c] sm:$0x1] %vm1120_vm3, %v3650_v26  ;;  %v1676_v48 = vrot.slane %v4541_v36, 1  ;;  %v867_v19 = vshrl.u32 %v4479_v63, 16  ;;  %v4565_v56 = vld [vmem:[#allocation2 + $0x9c] sm:$0xff]  }
 0x111   : > { %1128 = vst.msk [vmem:[#allocation2 + $0x30] sm:$0xf] %vm1117_vm2, %v3651_v8  ;;  %1129 = vst.msk [vmem:[#allocation2 + $0x34] sm:$0xf] %vm1117_vm2, %v3652_v17  ;;  %v870_v49 = vshll.u32 %v4479_v63, 16  ;;  %v2603_v50 = vsel %vm1672_vm4, %v2601_v38, %v2602_v45  ;;  %v1680_v51 = vrot.slane %v4539_v35, 1 }
 0x112   : > { %1125 = vst.msk [vmem:[#allocation2 + $0x24] sm:$0xf] %vm1117_vm2, %v3648_v23  ;;  %1126 = vst.msk [vmem:[#allocation2 + $0x28] sm:$0xf] %vm1117_vm2, %v3649_v24  ;;  %1833 = vrot.lane.b32.xlu0 %v4516_v25, %s4245_s26  ;;  %v1677_v55 = vrot.slane %v4544_v39, 1  ;;  %v869_v58 = vrot.slane %v867_v19, 7 }
 0x113   : > { %2319 = vrot.lane.b32.xlu1 %v4522_v28, %s4244_s25  ;;  %v4567_v57 = vld [vmem:[#allocation2 + $0xa4] ss:$0 sps:$4 sm:$0x11]   ;;  %v1681_v59 = vsel %vm1672_vm4, %v1679_v44, %v1680_v51  ;;  %v2637_v60 = vrot.slane %v4497_v11, 1  ;;  %v1928_v62 = vshll.u32 %v4485_v4, 16  ;;  %v2638_v3 = vrot.slane %v4555_v46, 1 }
 0x114   : > { %v1678_v63 = vsel %vm1672_vm4, %v1676_v48, %v1677_v55  ;;  %v872_v6 = vor.u32 %v870_v49, %v869_v58  ;;  %v939_v7 = vsel %vm4429_vm8, %v869_v58, 0  ;;  %v860_v12 = vshrl.u32 %v759_v61, 16  ;;  %v4579_v15 = vld [vmem:[#allocation2 + $0xb0] ss:$0 sps:$4 sm:$0x11]  }
 0x115   : > { %v3689_v10 = vcombine.low %v939_v7, %v939_v7  ;;  %v863_v13 = vshll.u32 %v759_v61, 16  ;;  %v1930_v16 = vrot.slane %v1928_v62, 1  ;;  %v1712_v8 = vrot.slane %v4565_v56, 1  ;;  %v4600_v44 = vld [vmem:[#allocation2 + $0x14] ss:$0 sps:$4 sm:$0x11]  }
 0x116   : > { %1857 = vrot.lane.b32.xlu0 %v4536_v33, %s4245_s26  ;;  %v1713_v17 = vrot.slane %v4567_v57, 1  ;;  %v923_v18 = vsel %vm4429_vm8, 0, %v872_v6  ;;  %v1926_v20 = vshrl.u32 %v4485_v4, 16  ;;  %v862_v23 = vrot.slane %v860_v12, 7 }
 0x117   : > { %2187 = vrot.lane.b32.xlu1 %v2142_v41, %s4246_s28  ;;  %v3687_v21 = vcombine.low %v923_v18, %v923_v18  ;;  %v3688_v22 = vcombine.high %v923_v18, %v923_v18  ;;  %1166 = vst.msk [vmem:[#allocation2 + $0xc8] sm:$0x1] %vm1120_vm3, %v3689_v10  ;;  %v1933_v24 = vshll.u32 %v4487_v5, 16  ;;  %v2639_v26 = vsel %vm1672_vm4, %v2637_v60, %v2638_v3  ;;  %v4605_v49 = vld [vmem:[#allocation2 + $0xa4] ss:$0 sps:$4 sm:$0x11]  }
 0x118   : > { %v1715_v29 = vrot.slane %v4577_v9, 1  ;;  %v1475_v34 = vshll.u32 %v4532_v32, 16  ;;  %v865_v4 = vor.u32 %v863_v13, %v862_v23  ;;  %v938_v38 = vsel %vm4429_vm8, %v862_v23, 0  ;;  %v4614_v61 = vld [vmem:[#allocation2 + $0xa4] ss:$0 sps:$4 sm:$0x11]  }
 0x119   : > { %1164 = vst.msk [vmem:[#allocation2 + $0xc0] sm:$0xf] %vm1117_vm2, %v3687_v21  ;;  %1165 = vst.msk [vmem:[#allocation2 + $0xc4] sm:$0xf] %vm1117_vm2, %v3688_v22  ;;  %v1716_v40 = vrot.slane %v4579_v15, 1  ;;  %v1931_v41 = vor.u32 %v1930_v16, %v1926_v20  ;;  %v1714_v5 = vsel %vm1672_vm4, %v1712_v8, %v1713_v17  ;;  %v3686_v43 = vcombine.low %v938_v38, %v938_v38  ;;  %v4636_v23 = vpop.f32.mrb[13].mxu0 }
 0x11a   : > { %2649 = vrot.lane.b32.xlu0 %v2603_v50, %s4247_s29  ;;  %v1477_v45 = vrot.slane %v1475_v34, 1  ;;  %v922_v48 = vsel %vm4429_vm8, 0, %v865_v4  ;;  %v1935_v19 = vrot.slane %v1933_v24, 1  ;;  %v2072_v50 = vshll.u32 %v4501_v14, 16 }
 0x11b   : > { %2211 = vrot.lane.b32.xlu1 %v2178_v54, %s4246_s28  ;;  %v3684_v51 = vcombine.low %v922_v48, %v922_v48  ;;  %v3685_v53 = vcombine.high %v922_v48, %v922_v48  ;;  %1163 = vst.msk [vmem:[#allocation2 + $0xbc] sm:$0x1] %vm1120_vm3, %v3686_v43  ;;  %v1473_v54 = vshrl.u32 %v4532_v32, 16  ;;  %v1480_v55 = vshll.u32 %v4539_v35, 16 }
 0x11c   : > { %v1717_v58 = vsel %vm1672_vm4, %v1715_v29, %v1716_v40  ;;  %v2137_v60 = vrot.slane %v4516_v25, 1  ;;  %v2077_v32 = vshll.u32 %v4520_v27, 16  ;;  %v1619_v35 = vshll.u32 %v4577_v9, 16 }
 0x11d   : > { %1161 = vst.msk [vmem:[#allocation2 + $0xb4] sm:$0xf] %vm1117_vm2, %v3684_v51  ;;  %1162 = vst.msk [vmem:[#allocation2 + $0xb8] sm:$0xf] %vm1117_vm2, %v3685_v53  ;;  %v1478_v62 = vor.u32 %v1477_v45, %v1473_v54  ;;  %v2138_v3 = vrot.slane %v4600_v44, 1  ;;  %v1482_v6 = vrot.slane %v1480_v55, 1  ;;  %v627_v22 = vadd.f32 %v4454_v37, %v4416_v31 }
 0x11e   : > { %1725 = vrot.lane.b32.xlu0 %v1681_v59, %s4242_s12  ;;  %v1936_v59 = vsel %vm1447_vm5, %v1931_v41, %v1935_v19  ;;  %v2070_v7 = vshrl.u32 %v4501_v14, 16  ;;  %v2380_v10 = vshll.u32 %v4483_v1, 16  ;;  %v2634_v13 = vrot.slane %v4522_v28, 1  ;;  %v4658_v54 = vpop.f32.mrb[14].mxu0 }
 0x11f   : > { %1723 = vrot.lane.b32.xlu1 %v1678_v63, %s4242_s12  ;;  %v2074_v63 = vrot.slane %v2072_v50, 1  ;;  %v2139_v12 = vsel %vm1672_vm4, %v2137_v60, %v2138_v3  ;;  %v2635_v16 = vrot.slane %v4605_v49, 1  ;;  %v1483_v27 = vsel %vm1447_vm5, %v1478_v62, %v1482_v6 }
 0x120   : > { %v2079_v17 = vrot.slane %v2077_v32, 1  ;;  %v1621_v18 = vrot.slane %v1619_v35, 1  ;;  %v2173_v20 = vrot.slane %v4536_v33, 1  ;;  %v2174_v14 = vrot.slane %v4614_v61, 1 }
 0x121   : > { %v2075_v8 = vor.u32 %v2074_v63, %v2070_v7  ;;  %v1624_v21 = vshll.u32 %v4579_v15, 16  ;;  %v1617_v24 = vshrl.u32 %v4577_v9, 16  ;;  %v2385_v29 = vshll.u32 %v4530_v30, 16 }
 0x122   : > { %2673 = vrot.lane.b32.xlu0 %v2639_v26, %s4247_s29  ;;  %v2382_v26 = vrot.slane %v2380_v10, 1  ;;  %v2524_v34 = vshll.u32 %v4497_v11, 16  ;;  %v2636_v4 = vsel %vm1672_vm4, %v2634_v13, %v2635_v16  ;;  %v2512_v38 = vshll.u32 %v4522_v28, 16 }
 0x123   : > { %1747 = vrot.lane.b32.xlu1 %v1714_v5, %s4242_s12  ;;  %v619_v40 = vadd.f32 %v4416_v31, %v4457_v42  ;;  %v630_v15 = vadd.f32 %v4465_v47, %v4416_v31  ;;  %v2080_v37 = vsel %vm1447_vm5, %v2075_v8, %v2079_v17  ;;  %v1622_v9 = vor.u32 %v1621_v18, %v1617_v24 }
 0x124   : > { %v2378_v41 = vshrl.u32 %v4483_v1, 16  ;;  %v2529_v30 = vshll.u32 %v4555_v46, 16  ;;  %v1626_v5 = vrot.slane %v1624_v21, 1  ;;  %v2522_v43 = vshrl.u32 %v4497_v11, 16 }
 0x125   : > { %v1463_v45 = vshll.u32 %v4541_v36, 16  ;;  %v622_v42 = vadd.f32 %v4416_v31, %v4471_v52  ;;  %v2175_v47 = vsel %vm1672_vm4, %v2173_v20, %v2174_v14  ;;  %v2387_v19 = vrot.slane %v2385_v29, 1 }
 0x126   : > { %1749 = vrot.lane.b32.xlu0 %v1717_v58, %s4242_s12  ;;  %v2383_v48 = vor.u32 %v2382_v26, %v2378_v41  ;;  %v2526_v50 = vrot.slane %v2524_v34, 1  ;;  %v2514_v51 = vrot.slane %v2512_v38, 1  ;;  %v1607_v1 = vshll.u32 %v4565_v56, 16 }
 0x127   : > { %2107 = vrot.lane.b32.xlu1 %v1936_v59, %s4248_s30  ;;  %v723_v53 = vmax.f32 %v627_v22, 0.0  ;;  %v721_v46 = vmax.f32 %v619_v40, 0.0  ;;  %v1627_v11 = vsel %vm1447_vm5, %v1622_v9, %v1626_v5  ;;  %v2531_v55 = vrot.slane %v2529_v30, 1  ;;  %v4663_v59 = vpop.f32.mrb[15].mxu0 }
 0x128   : > { %v2510_v58 = vshrl.u32 %v4522_v28, 16  ;;  %v724_v52 = vmax.f32 %v630_v15, 0.0  ;;  %v2517_v60 = vshll.u32 %v4605_v49, 16  ;;  %v1612_v62 = vshll.u32 %v4567_v57, 16  ;;  %v4670_v10 = vpop.f32.mrb[16].mxu0  ;;  %v4672_v28 = vld [vmem:[#allocation2 + $0x30] sm:$0xff]  }
 0x129   : > { %v1465_v63 = vrot.slane %v1463_v45, 1  ;;  %v722_v32 = vmax.f32 %v622_v42, 0.0  ;;  %v2388_v35 = vsel %vm1447_vm5, %v2383_v48, %v2387_v19  ;;  %v2527_v3 = vor.u32 %v2526_v50, %v2522_v43  ;;  %v4675_v49 = vpop.f32.mrb[17].mxu0 }
 0x12a   : > { %2185 = vrot.lane.b32.xlu0 %v2139_v12, %s4246_s28  ;;  %v1916_v6 = vshll.u32 %v4516_v25, 16  ;;  %v750_v7 = vpack.c.bf16 %v724_v52, %v723_v53  ;;  %v2515_v12 = vor.u32 %v2514_v51, %v2510_v58  ;;  %v1609_v13 = vrot.slane %v1607_v1, 1  ;;  %v4679_v18 = vpop.f32.mrb[18].mxu0 }
 0x12b   : > { %1644 = vrot.lane.b32.xlu1 %v1483_v27, %s4243_s18  ;;  %v1461_v16 = vshrl.u32 %v4541_v36, 16  ;;  %v749_v27 = vpack.c.bf16 %v722_v32, %v721_v46  ;;  %v1468_v57 = vshll.u32 %v4544_v39, 16  ;;  %v2519_v20 = vrot.slane %v2517_v60, 1  ;;  %v4690_v9 = vpop.f32.mrb[19].mxu0 }
 0x12c   : > { %v797_v8 = vshrl.u32 %v750_v7, 16  ;;  %v800_v17 = vshll.u32 %v750_v7, 16  ;;  %v1605_v14 = vshrl.u32 %v4565_v56, 16  ;;  %v2532_v22 = vsel %vm1447_vm5, %v2527_v3, %v2531_v55  ;;  %v4696_v43 = vpop.f32.mrb[20].mxu0 }
 0x12d   : > { %v790_v21 = vshrl.u32 %v749_v27, 16  ;;  %v793_v36 = vshll.u32 %v749_v27, 16  ;;  %v1466_v24 = vor.u32 %v1465_v63, %v1461_v16  ;;  %v1918_v26 = vrot.slane %v1916_v6, 1  ;;  %v4701_v19 = vpop.f32.mrb[21].mxu0  ;;  %v4727_v6 = vld [vmem:[#allocation2 + $0x30] sm:$0xff]  }
 0x12e   : > { %2671 = vrot.lane.b32.xlu0 %v2636_v4, %s4247_s29  ;;  %v799_v29 = vrot.slane %v797_v8, 7  ;;  %v2520_v34 = vsel %vm1447_vm5, %v2515_v12, %v2519_v20  ;;  %v1614_v39 = vrot.slane %v1612_v62, 1  ;;  %v1914_v4 = vshrl.u32 %v4516_v25, 16  ;;  %v4707_v53 = vpop.f32.mrb[22].mxu0  ;;  %v4719_v62 = vld [vmem:[#allocation2 + $0x24] sm:$0xff]  }
 0x12f   : > { %2131 = vrot.lane.b32.xlu1 %v2080_v37, %s4248_s30  ;;  %v792_v38 = vrot.slane %v790_v21, 7  ;;  %v1610_v40 = vor.u32 %v1609_v13, %v1605_v14  ;;  %v1470_v15 = vrot.slane %v1468_v57, 1  ;;  %v1921_v41 = vshll.u32 %v4600_v44, 16  ;;  %v4712_v58 = vpop.f32.mrb[23].mxu0  ;;  %v4730_v13 = vld [vmem:[#allocation2 + $0xb4] sm:$0xff]   ;;  %v4741_v8 = vld [vmem:[#allocation2 + $0x24] sm:$0xff]  }
 0x130   : > { %v802_v37 = vor.u32 %v800_v17, %v799_v29  ;;  %v929_v56 = vsel %vm4429_vm8, %v799_v29, 0  ;;  %v1919_v42 = vor.u32 %v1918_v26, %v1914_v4  ;;  %v2060_v1 = vshll.u32 %v4536_v33, 16  ;;  %v4090_v60 = vld [vmem:[#allocation2 + $0x38] ss:$0 sps:$4 sm:$0x11]   ;;  %v4755_v26 = vld [vmem:[#allocation2 + $0x24] sm:$0xff]  }
 0x131   : > { %v3659_v30 = vcombine.low %v929_v56, %v929_v56  ;;  %v795_v5 = vor.u32 %v793_v36, %v792_v38  ;;  %v928_v25 = vsel %vm4429_vm8, %v792_v38, 0  ;;  %v1471_v45 = vsel %vm1447_vm5, %v1466_v24, %v1470_v15  ;;  %v4732_v27 = vld [vmem:[#allocation2 + $0x2c] ss:$0 sps:$4 sm:$0x11]   ;;  %v4752_v24 = vld [vmem:[#allocation2 + $0x30] sm:$0xff]  }
 0x132   : > { %2209 = vrot.lane.b32.xlu0 %v2175_v47, %s4246_s28  ;;  %v913_v47 = vsel %vm4429_vm8, 0, %v802_v37  ;;  %v3656_v48 = vcombine.low %v928_v25, %v928_v25  ;;  %v1615_v46 = vsel %vm1447_vm5, %v1610_v40, %v1614_v39  ;;  %v1923_v52 = vrot.slane %v1921_v41, 1  ;;  %v4746_v14 = vld [vmem:[#allocation2 + $0xbc] ss:$0 sps:$4 sm:$0x11]   ;;  %v4757_v29 = vld [vmem:[#allocation2 + $0xb4] sm:$0xff]  }
 0x133   : > { %1668 = vrot.lane.b32.xlu1 %v1627_v11, %s4243_s18  ;;  %v3657_v50 = vcombine.low %v913_v47, %v913_v47  ;;  %v3658_v51 = vcombine.high %v913_v47, %v913_v47  ;;  %1136 = vst.msk [vmem:[#allocation2 + $0x50] sm:$0x1] %vm1120_vm3, %v3659_v30  ;;  %v912_v44 = vsel %vm4429_vm8, 0, %v795_v5  ;;  %v2062_v32 = vrot.slane %v2060_v1, 1 }
 0x134   : > { %v3654_v11 = vcombine.low %v912_v44, %v912_v44  ;;  %v3655_v55 = vcombine.high %v912_v44, %v912_v44  ;;  %1133 = vst.msk [vmem:[#allocation2 + $0x44] sm:$0x1] %vm1120_vm3, %v3656_v48  ;;  %v1924_v63 = vsel %vm1447_vm5, %v1919_v42, %v1923_v52  ;;  %v2065_v3 = vshll.u32 %v4614_v61, 16  ;;  %v4762_v38 = vld [vmem:[#allocation2 + $0x38] ss:$0 sps:$4 sm:$0x11]  }
 0x135   : > { %1134 = vst.msk [vmem:[#allocation2 + $0x48] sm:$0xf] %vm1117_vm2, %v3657_v50  ;;  %1135 = vst.msk [vmem:[#allocation2 + $0x4c] sm:$0xf] %vm1117_vm2, %v3658_v51  ;;  %v2146_v7 = vrot.slane %v4672_v28, 1  ;;  %v2147_v12 = vrot.slane %v4090_v60, 1  ;;  %v646_v17 = vadd.f32 %v4658_v54, %v4416_v31  ;;  %v635_v4 = vadd.f32 %v4416_v31, %v4636_v23 }
 0x136   : > { %2569 = vrot.lane.b32.xlu0 %v2388_v35, %s4249_s11  ;;  %1131 = vst.msk [vmem:[#allocation2 + $0x3c] sm:$0xf] %vm1117_vm2, %v3654_v11  ;;  %1132 = vst.msk [vmem:[#allocation2 + $0x40] sm:$0xf] %vm1117_vm2, %v3655_v55  ;;  %v2058_v35 = vshrl.u32 %v4536_v33, 16  ;;  %v1952_v57 = vshll.u32 %v4672_v28, 16  ;;  %v643_v33 = vadd.f32 %v4481_v0, %v4416_v31  ;;  %v638_v37 = vadd.f32 %v4416_v31, %v4663_v59 }
 0x137   : > { %1839 = vrot.lane.b32.xlu1 %v4672_v28, %s4245_s26  ;;  %v2067_v61 = vrot.slane %v2065_v3, 1  ;;  %v2148_v20 = vsel %vm1672_vm4, %v2146_v7, %v2147_v12  ;;  %v1682_v36 = vrot.slane %v4741_v8, 1  ;;  %v1950_v0 = vshrl.u32 %v4672_v28, 16  ;;  %v4099_v15 = vld [vmem:[#allocation2 + $0x38] ss:$0 sps:$4 sm:$0x11]  }
 0x138   : > { %v2063_v16 = vor.u32 %v2062_v32, %v2058_v35  ;;  %v1954_v54 = vrot.slane %v1952_v57, 1  ;;  %v727_v39 = vmax.f32 %v643_v33, 0.0  ;;  %v728_v40 = vmax.f32 %v646_v17, 0.0  ;;  %v4096_v23 = vld [vmem:[#allocation2 + $0xb4] sm:$0xff]  }
 0x139   : > { %v1718_v28 = vrot.slane %v4757_v29, 1  ;;  %v1719_v56 = vrot.slane %v4746_v14, 1  ;;  %v1499_v41 = vshll.u32 %v4752_v24, 16  ;;  %v725_v42 = vmax.f32 %v635_v4, 0.0 }
 0x13a   : > { %2593 = vrot.lane.b32.xlu0 %v2532_v22, %s4249_s11  ;;  %v2068_v21 = vsel %vm1447_vm5, %v2063_v16, %v2067_v61  ;;  %v1683_v22 = vrot.slane %v4732_v27, 1  ;;  %v752_v30 = vpack.c.bf16 %v728_v40, %v727_v39  ;;  %v1955_v25 = vor.u32 %v1954_v54, %v1950_v0  ;;  %v4776_v44 = vld [vmem:[#allocation2 + $0x2c] ss:$0 sps:$4 sm:$0x11]  }
 0x13b   : > { %2591 = vrot.lane.b32.xlu1 %v2520_v34, %s4249_s11  ;;  %v1957_v34 = vshll.u32 %v4090_v60, 16  ;;  %v2607_v47 = vrot.slane %v4727_v6, 1  ;;  %v2608_v31 = vrot.slane %v4762_v38, 1  ;;  %v1497_v50 = vshrl.u32 %v4752_v24, 16  ;;  %v4139_v60 = vld [vmem:[%s5691_s3] sm:$0xff]  }
 0x13c   : > { %v1684_v5 = vsel %vm1672_vm4, %v1682_v36, %v1683_v22  ;;  %v811_v59 = vshrl.u32 %v752_v30, 16  ;;  %v814_v48 = vshll.u32 %v752_v30, 16  ;;  %v1504_v51 = vshll.u32 %v4099_v15, 16  ;;  %3908 = vmatprep.subr.bf16.mxu1 %v4139_v60 }
 0x13d   : > { %v726_v1 = vmax.f32 %v638_v37, 0.0  ;;  %v1501_v11 = vrot.slane %v1499_v41, 1  ;;  %v2392_v55 = vshll.u32 %v4719_v62, 16  ;;  %v1685_v32 = vrot.slane %v4752_v24, 1  ;;  %3909 = vmatpush3.bf16.msra.mxu1 %v4139_v60 }
 0x13e   : > { %1642 = vrot.lane.b32.xlu0 %v1471_v45, %s4243_s18  ;;  %v1959_v45 = vrot.slane %v1957_v34, 1  ;;  %v813_v52 = vrot.slane %v811_v59, 7  ;;  %v1686_v35 = vrot.slane %v4099_v15, 1  ;;  %v2609_v7 = vsel %vm1672_vm4, %v2607_v47, %v2608_v31 }
 0x13f   : > { %1666 = vrot.lane.b32.xlu1 %v1615_v46, %s4243_s18  ;;  %v1720_v46 = vsel %vm1672_vm4, %v1718_v28, %v1719_v56  ;;  %v751_v3 = vpack.c.bf16 %v726_v1, %v725_v42  ;;  %v2390_v12 = vshrl.u32 %v4719_v62, 16  ;;  %v1506_v33 = vrot.slane %v1504_v51, 1  ;;  %v4802_v28 = vld [vmem:[#allocation2 + $0x2c] ss:$0 sps:$4 sm:$0x11]  }
 0x140   : > { %v816_v16 = vor.u32 %v814_v48, %v813_v52  ;;  %v931_v57 = vsel %vm4429_vm8, %v813_v52, 0  ;;  %v1502_v36 = vor.u32 %v1501_v11, %v1497_v50  ;;  %v2394_v22 = vrot.slane %v2392_v55, 1  ;;  %v4103_v48 = vld [vmem:[#allocation2 + $0xbc] ss:$0 sps:$4 sm:$0x11]  }
 0x141   : > { %v3665_v61 = vcombine.low %v931_v57, %v931_v57  ;;  %v804_v17 = vshrl.u32 %v751_v3, 16  ;;  %v2397_v0 = vshll.u32 %v4776_v44, 16  ;;  %v1487_v54 = vshll.u32 %v4741_v8, 16 }
 0x142   : > { %2105 = vrot.lane.b32.xlu0 %v1924_v63, %s4248_s30  ;;  %v1960_v63 = vsel %vm1447_vm5, %v1955_v25, %v1959_v45  ;;  %v915_v24 = vsel %vm4429_vm8, 0, %v816_v16  ;;  %v1687_v40 = vsel %vm1672_vm4, %v1685_v32, %v1686_v35  ;;  %v2604_v15 = vrot.slane %v4719_v62, 1  ;;  %v4837_v16 = vld [vmem:[%s5690_s2] ss:$0 sm:$0xff] }
 0x143   : > { %2299 = vrot.lane.b32.xlu1 %v4719_v62, %s4244_s25  ;;  %v3663_v34 = vcombine.low %v915_v24, %v915_v24  ;;  %v3664_v39 = vcombine.high %v915_v24, %v915_v24  ;;  %1142 = vst.msk [vmem:[#allocation2 + $0x68] sm:$0x1] %vm1120_vm3, %v3665_v61  ;;  %v806_v4 = vrot.slane %v804_v17, 7  ;;  %v2605_v37 = vrot.slane %v4776_v44, 1  ;;  %v4852_v24 = vld [vmem:[#allocation2 + $0x48] sm:$0xff]  }
 0x144   : > { %v2399_v30 = vrot.slane %v2397_v0, 1  ;;  %v1507_v45 = vsel %vm1447_vm5, %v1502_v36, %v1506_v33  ;;  %v2395_v62 = vor.u32 %v2394_v22, %v2390_v12  ;;  %v1489_v42 = vrot.slane %v1487_v54, 1 }
 0x145   : > { %1140 = vst.msk [vmem:[#allocation2 + $0x60] sm:$0xf] %vm1117_vm2, %v3663_v34  ;;  %1141 = vst.msk [vmem:[#allocation2 + $0x64] sm:$0xf] %vm1117_vm2, %v3664_v39  ;;  %v930_v41 = vsel %vm4429_vm8, %v806_v4, 0  ;;  %v2143_v31 = vrot.slane %v4755_v26, 1  ;;  %v2606_v51 = vsel %vm1672_vm4, %v2604_v15, %v2605_v37  ;;  %v659_v57 = vadd.f32 %v4837_v16, %v4670_v10 }
 0x146   : > { %2301 = vrot.lane.b32.xlu0 %v4727_v6, %s4244_s25  ;;  %v3662_v25 = vcombine.low %v930_v41, %v930_v41  ;;  %v2144_v59 = vrot.slane %v4802_v28, 1  ;;  %v2400_v44 = vsel %vm1447_vm5, %v2395_v62, %v2399_v30  ;;  %v2536_v11 = vshll.u32 %v4730_v13, 16 }
 0x147   : > { %2323 = vrot.lane.b32.xlu1 %v4730_v13, %s4244_s25  ;;  %v2541_v52 = vshll.u32 %v4103_v48, 16  ;;  %v2409_v60 = vshll.u32 %v4762_v38, 16  ;;  %v2641_v32 = vrot.slane %v4103_v48, 1  ;;  %v2402_v35 = vshrl.u32 %v4727_v6, 16 }
 0x148   : > { %1139 = vst.msk [vmem:[#allocation2 + $0x5c] sm:$0x1] %vm1120_vm3, %v3662_v25  ;;  %v2145_v55 = vsel %vm1672_vm4, %v2143_v31, %v2144_v59  ;;  %v1940_v12 = vshll.u32 %v4755_v26, 16  ;;  %v651_v38 = vadd.f32 %v4837_v16, %v4675_v49  ;;  %v662_v61 = vadd.f32 %v4837_v16, %v4679_v18  ;;  %v4106_v59 = vld [vmem:[#allocation2 + $0x50] ss:$0 sps:$4 sm:$0x11]  }
 0x149   : > { %v2543_v17 = vrot.slane %v2541_v52, 1  ;;  %v731_v10 = vmax.f32 %v659_v57, 0.0  ;;  %v1938_v22 = vshrl.u32 %v4755_v26, 16  ;;  %v1945_v34 = vshll.u32 %v4802_v28, 16  ;;  %v4879_v52 = vld [vmem:[#allocation2 + $0x3c] sm:$0xff]  }
 0x14a   : > { %2129 = vrot.lane.b32.xlu0 %v2068_v21, %s4248_s30  ;;  %v4140_v21 = vld [vmem:[%s5691_s3 + $0x8] sm:$0xff]   ;;  %v732_v0 = vmax.f32 %v662_v61, 0.0  ;;  %v1942_v54 = vrot.slane %v1940_v12, 1  ;;  %v729_v39 = vmax.f32 %v651_v38, 0.0  ;;  %v654_v18 = vadd.f32 %v4837_v16, %v4690_v9  ;;  %v4895_v38 = vld [vmem:[#allocation2 + $0x3c] sm:$0xff]  }
 0x14b   : > { %2191 = vrot.lane.b32.xlu1 %v2148_v20, %s4246_s28  ;;  %v807_v20 = vshll.u32 %v751_v3, 16  ;;  %3910 = vmatprep.subr.bf16.mxu1 %v4140_v21  ;;  %v1947_v30 = vrot.slane %v1945_v34, 1  ;;  %v1974_v12 = vshrl.u32 %v4852_v24, 16 }
 0x14c   : > { %3911 = vmatpush3.bf16.msra.mxu1 %v4140_v21  ;;  %v1629_v21 = vshrl.u32 %v4757_v29, 16  ;;  %v754_v15 = vpack.c.bf16 %v732_v0, %v731_v10  ;;  %v1943_v28 = vor.u32 %v1942_v54, %v1938_v22  ;;  %v1688_v10 = vrot.slane %v4895_v38, 1  ;;  %v4115_v2 = vld [vmem:[#allocation2 + $0x60] sm:$0xff]  }
 0x14d   : > { %v809_v56 = vor.u32 %v807_v20, %v806_v4  ;;  %v2411_v20 = vrot.slane %v2409_v60, 1  ;;  %v4881_v60 = vld [vmem:[#allocation2 + $0x48] sm:$0xff]  }
 0x14e   : > { %1837 = vrot.lane.b32.xlu0 %v4755_v26, %s4245_s26  ;;  %v730_v26 = vmax.f32 %v654_v18, 0.0  ;;  %v825_v37 = vshrl.u32 %v754_v15, 16  ;;  %v1948_v31 = vsel %vm1447_vm5, %v1943_v28, %v1947_v30  ;;  %v2613_v0 = vrot.slane %v4881_v60, 1 }
 0x14f   : > { %1727 = vrot.lane.b32.xlu1 %v1684_v5, %s4242_s12  ;;  %v1485_v5 = vshrl.u32 %v4741_v8, 16  ;;  %v914_v47 = vsel %vm4429_vm8, 0, %v809_v56  ;;  %v828_v56 = vshll.u32 %v754_v15, 16 }
 0x150   : > { %v3660_v8 = vcombine.low %v914_v47, %v914_v47  ;;  %v3661_v50 = vcombine.high %v914_v47, %v914_v47 }
 0x151   : > { %v1490_v1 = vor.u32 %v1489_v42, %v1485_v5  ;;  %v753_v5 = vpack.c.bf16 %v730_v26, %v729_v39  ;;  %v4917_v39 = vpop.permute.xlu0 %1640 }
 0x152   : > { %1861 = vrot.lane.b32.xlu0 %v4096_v23, %s4245_s26  ;;  %v1492_v23 = vshll.u32 %v4732_v27, 16  ;;  %v2404_v27 = vshll.u32 %v4727_v6, 16  ;;  %1137 = vst.msk [vmem:[#allocation2 + $0x54] sm:$0xf] %vm1117_vm2, %v3660_v8  ;;  %1138 = vst.msk [vmem:[#allocation2 + $0x58] sm:$0xf] %vm1117_vm2, %v3661_v50 }
 0x153   : > { %1751 = vrot.lane.b32.xlu1 %v1720_v46, %s4242_s12  ;;  %v2538_v6 = vrot.slane %v2536_v11, 1  ;;  %v821_v62 = vshll.u32 %v753_v5, 16 }
 0x154   : > { %v1494_v46 = vrot.slane %v1492_v23, 1  ;;  %v2406_v3 = vrot.slane %v2404_v27, 1  ;;  %v1976_v27 = vshll.u32 %v4852_v24, 16 }
 0x156   : > { %2653 = vrot.lane.b32.xlu0 %v2609_v7, %s4247_s29  ;;  %v2534_v7 = vshrl.u32 %v4730_v13, 16  ;;  %v1495_v33 = vsel %vm1447_vm5, %v1490_v1, %v1494_v46  ;;  %v2407_v49 = vor.u32 %v2406_v3, %v2402_v35  ;;  %v2153_v3 = vrot.slane %v4106_v59, 1 }
 0x157   : > { %2111 = vrot.lane.b32.xlu1 %v1960_v63, %s4248_s30  ;;  %v2640_v63 = vrot.slane %v4730_v13, 1  ;;  %v1631_v13 = vshll.u32 %v4757_v29, 16 }
 0x158   : > { %v2539_v4 = vor.u32 %v2538_v6, %v2534_v7  ;;  %v2412_v41 = vsel %vm1447_vm5, %v2407_v49, %v2411_v20  ;;  %v4886_v7 = vld [vmem:[#allocation2 + $0x50] ss:$0 sps:$4 sm:$0x11]   ;;  %v1981_v6 = vshll.u32 %v4106_v59, 16  ;;  %v675_v49 = vadd.f32 %v4837_v16, %v4696_v43  ;;  %v4920_v43 = vpop.permute.xlu1 %1721 }
 0x159   : > { %v2642_v36 = vsel %vm1672_vm4, %v2640_v63, %v2641_v32  ;;  %v1633_v29 = vrot.slane %v1631_v13, 1  ;;  %v2152_v63 = vrot.slane %v4852_v24, 1  ;;  %v4884_v32 = vld [vmem:[#allocation2 + $0x44] ss:$0 sps:$4 sm:$0x11]  }
 0x15a   : > { %1729 = vrot.lane.b32.xlu0 %v1687_v40, %s4242_s12  ;;  %v1636_v40 = vshll.u32 %v4746_v14, 16  ;;  %v2544_v9 = vsel %vm1447_vm5, %v2539_v4, %v2543_v17  ;;  %v818_v14 = vshrl.u32 %v753_v5, 16  ;;  %v4112_v13 = vld [vmem:[#allocation2 + $0x50] ss:$0 sps:$4 sm:$0x11]   ;;  %v1689_v22 = vrot.slane %v4884_v32, 1 }
 0x15b   : > { %1648 = vrot.lane.b32.xlu1 %v1507_v45, %s4243_s18  ;;  %v1634_v23 = vor.u32 %v1633_v29, %v1629_v21  ;;  %v827_v45 = vrot.slane %v825_v37, 7  ;;  %v4901_v21 = vld [vmem:[#allocation2 + $0x3c] sm:$0xff]   ;;  %v2154_v34 = vsel %vm1672_vm4, %v2152_v63, %v2153_v3  ;;  %v1983_v4 = vrot.slane %v1981_v6, 1  ;;  %v4923_v37 = vld [vmem:[#allocation2 + $0x44] ss:$0 sps:$4 sm:$0x11]  }
 0x15c   : > { %v1638_v25 = vrot.slane %v1636_v40, 1  ;;  %v820_v8 = vrot.slane %v818_v14, 7  ;;  %v1692_v29 = vrot.slane %v4112_v13, 1  ;;  %v1528_v26 = vshll.u32 %v4112_v13, 16 }
 0x15d   : > { %v830_v42 = vor.u32 %v828_v56, %v827_v45  ;;  %v933_v47 = vsel %vm4429_vm8, %v827_v45, 0  ;;  %v667_v56 = vadd.f32 %v4837_v16, %v4701_v19  ;;  %v735_v30 = vmax.f32 %v675_v49, 0.0 }
 0x15e   : > { %2651 = vrot.lane.b32.xlu0 %v2606_v51, %s4247_s29  ;;  %v3671_v48 = vcombine.low %v933_v47, %v933_v47  ;;  %v1639_v50 = vsel %vm1447_vm5, %v1634_v23, %v1638_v25  ;;  %v823_v11 = vor.u32 %v821_v62, %v820_v8  ;;  %v678_v5 = vadd.f32 %v4837_v16, %v4707_v53 }
 0x15f   : > { %2571 = vrot.lane.b32.xlu1 %v2400_v44, %s4249_s11  ;;  %v917_v51 = vsel %vm4429_vm8, 0, %v830_v42  ;;  %v4874_v44 = vld [vmem:[#allocation2 + $0x48] sm:$0xff]   ;;  %v2416_v19 = vshll.u32 %v4879_v52, 16  ;;  %v1530_v42 = vrot.slane %v1528_v26, 1  ;;  %v733_v47 = vmax.f32 %v667_v56, 0.0 }
 0x160   : > { %v3669_v1 = vcombine.low %v917_v51, %v917_v51  ;;  %v3670_v46 = vcombine.high %v917_v51, %v917_v51  ;;  %1148 = vst.msk [vmem:[#allocation2 + $0x80] sm:$0x1] %vm1120_vm3, %v3671_v48  ;;  %v916_v57 = vsel %vm4429_vm8, 0, %v823_v11  ;;  %v1523_v20 = vshll.u32 %v4874_v44, 16 }
 0x161   : > { %v3666_v61 = vcombine.low %v916_v57, %v916_v57  ;;  %v3667_v17 = vcombine.high %v916_v57, %v916_v57  ;;  %v1691_v54 = vrot.slane %v4874_v44, 1  ;;  %v1521_v40 = vshrl.u32 %v4874_v44, 16 }
 0x162   : > { %2189 = vrot.lane.b32.xlu0 %v2145_v55, %s4246_s28  ;;  %v932_v55 = vsel %vm4429_vm8, %v820_v8, 0  ;;  %1146 = vst.msk [vmem:[#allocation2 + $0x78] sm:$0xf] %vm1117_vm2, %v3669_v1  ;;  %1147 = vst.msk [vmem:[#allocation2 + $0x7c] sm:$0xf] %vm1117_vm2, %v3670_v46  ;;  %v1525_v15 = vrot.slane %v1523_v20, 1  ;;  %v670_v53 = vadd.f32 %v4837_v16, %v4712_v58 }
 0x163   : > { %1646 = vrot.lane.b32.xlu1 %v1495_v33, %s4243_s18  ;;  %v3668_v35 = vcombine.low %v932_v55, %v932_v55  ;;  %v1978_v33 = vrot.slane %v1976_v27, 1  ;;  %1143 = vst.msk [vmem:[#allocation2 + $0x6c] sm:$0xf] %vm1117_vm2, %v3666_v61  ;;  %1144 = vst.msk [vmem:[#allocation2 + $0x70] sm:$0xf] %vm1117_vm2, %v3667_v17  ;;  %v1693_v45 = vsel %vm1672_vm4, %v1691_v54, %v1692_v29  ;;  %v736_v14 = vmax.f32 %v678_v5, 0.0 }
 0x164   : > { %v1526_v62 = vor.u32 %v1525_v15, %v1521_v40  ;;  %v2414_v48 = vshrl.u32 %v4879_v52, 16  ;;  %v2428_v8 = vshll.u32 %v4881_v60, 16  ;;  %v2149_v44 = vrot.slane %v4901_v21, 1 }
 0x165   : > { %1145 = vst.msk [vmem:[#allocation2 + $0x74] sm:$0x1] %vm1120_vm3, %v3668_v35  ;;  %v1979_v18 = vor.u32 %v1978_v33, %v1974_v12  ;;  %v2150_v1 = vrot.slane %v4923_v37, 1  ;;  %v734_v46 = vmax.f32 %v670_v53, 0.0  ;;  %v2418_v58 = vrot.slane %v2416_v19, 1 }
 0x166   : > { %2675 = vrot.lane.b32.xlu0 %v2642_v36, %s4247_s29  ;;  %v4904_v36 = vld [vmem:[#allocation2 + $0x44] ss:$0 sps:$4 sm:$0x11]   ;;  %v1511_v16 = vshll.u32 %v4895_v38, 16  ;;  %v1509_v63 = vshrl.u32 %v4895_v38, 16  ;;  %v1516_v35 = vshll.u32 %v4884_v32, 16 }
 0x167   : > { %1843 = vrot.lane.b32.xlu1 %v4852_v24, %s4245_s26  ;;  %v2614_v24 = vrot.slane %v4886_v7, 1  ;;  %v2611_v28 = vrot.slane %v4904_v36, 1  ;;  %v1984_v25 = vsel %vm1447_vm5, %v1979_v18, %v1983_v4  ;;  %v2421_v51 = vshll.u32 %v4904_v36, 16 }
 0x168   : > { %v755_v3 = vpack.c.bf16 %v734_v46, %v733_v47  ;;  %v2426_v57 = vshrl.u32 %v4881_v60, 16  ;;  %v2430_v33 = vrot.slane %v2428_v8, 1  ;;  %v2433_v6 = vshll.u32 %v4886_v7, 16 }
 0x169   : > { %v2615_v23 = vsel %vm1672_vm4, %v2613_v0, %v2614_v24  ;;  %v2423_v17 = vrot.slane %v2421_v51, 1  ;;  %v1964_v20 = vshll.u32 %v4901_v21, 16  ;;  %v2419_v38 = vor.u32 %v2418_v58, %v2414_v48  ;;  %v5006_v51 = vld [vmem:[#allocation2 + $0x60] sm:$0xff]  }
 0x16a   : > { %2573 = vrot.lane.b32.xlu0 %v2412_v41, %s4249_s11  ;;  %v2610_v41 = vrot.slane %v4879_v52, 1  ;;  %v835_v36 = vshll.u32 %v755_v3, 16  ;;  %v1513_v32 = vrot.slane %v1511_v16, 1  ;;  %v1962_v7 = vshrl.u32 %v4901_v21, 16 }
 0x16b   : > { %2595 = vrot.lane.b32.xlu1 %v2544_v9, %s4249_s11  ;;  %v1690_v9 = vsel %vm1672_vm4, %v1688_v10, %v1689_v22  ;;  %v832_v10 = vshrl.u32 %v755_v3, 16  ;;  %v2435_v18 = vrot.slane %v2433_v6, 1  ;;  %v1969_v4 = vshll.u32 %v4923_v37, 16  ;;  %v5022_v3 = vld [vmem:[#allocation2 + $0x68] ss:$0 sps:$4 sm:$0x11]  }
 0x16c   : > { %v2612_v59 = vsel %vm1672_vm4, %v2610_v41, %v2611_v28  ;;  %v1966_v15 = vrot.slane %v1964_v20, 1  ;;  %v1514_v28 = vor.u32 %v1513_v32, %v1509_v63  ;;  %v2000_v46 = vshll.u32 %v4115_v2, 16  ;;  %v5018_v63 = vld [vmem:[#allocation2 + $0x60] sm:$0xff]  }
 0x16d   : > { %v834_v24 = vrot.slane %v832_v10, 7  ;;  %v2158_v16 = vrot.slane %v4115_v2, 1  ;;  %v1998_v6 = vshrl.u32 %v4115_v2, 16  ;;  %v2620_v32 = vrot.slane %v5022_v3, 1 }
 0x16e   : > { %2109 = vrot.lane.b32.xlu0 %v1948_v31, %s4248_s30  ;;  %v2002_v10 = vrot.slane %v2000_v46, 1 }
 0x16f   : > { %1670 = vrot.lane.b32.xlu1 %v1639_v50, %s4243_s18  ;;  %v756_v50 = vpack.c.bf16 %v736_v14, %v735_v30  ;;  %v837_v41 = vor.u32 %v835_v36, %v834_v24  ;;  %v1518_v30 = vrot.slane %v1516_v35, 1  ;;  %v934_v37 = vsel %vm4429_vm8, %v834_v24, 0 }
 0x170   : > { %v2003_v24 = vor.u32 %v2002_v10, %v1998_v6 }
 0x171   : > { %v839_v11 = vshrl.u32 %v756_v50, 16  ;;  %v842_v55 = vshll.u32 %v756_v50, 16  ;;  %v918_v5 = vsel %vm4429_vm8, 0, %v837_v41  ;;  %v1519_v47 = vsel %vm1447_vm5, %v1514_v28, %v1518_v30  ;;  %v4142_v50 = vld [vmem:[%s5691_s3 + $0x10] ss:$0 sps:$4 sm:$0x33]  }
 0x172   : > { %2305 = vrot.lane.b32.xlu0 %v4881_v60, %s4244_s25  ;;  %v2151_v60 = vsel %vm1672_vm4, %v2149_v44, %v2150_v1  ;;  %v5009_v44 = vld [vmem:[#allocation2 + $0x54] sm:$0xff]   ;;  %v5011_v1 = vld [vmem:[#allocation2 + $0x5c] ss:$0 sps:$4 sm:$0x11]   ;;  %3994 = vmatprep.subr.msk.bf16.mxu1 %vm3004_vm9, %v4142_v50 }
 0x173   : > { %2303 = vrot.lane.b32.xlu1 %v4879_v52, %s4244_s25  ;;  %v1531_v52 = vsel %vm1447_vm5, %v1526_v62, %v1530_v42  ;;  %v841_v13 = vrot.slane %v839_v11, 7  ;;  %v1967_v62 = vor.u32 %v1966_v15, %v1962_v7  ;;  %v1971_v42 = vrot.slane %v1969_v4, 1  ;;  %v4125_v7 = vld [vmem:[#allocation2 + $0x5c] ss:$0 sps:$4 sm:$0x11]  }
 0x174   : > { %v1695_v20 = vrot.slane %v5011_v1, 1  ;;  %v1697_v15 = vrot.slane %v5018_v63, 1  ;;  %v2440_v28 = vshll.u32 %v5009_v44, 16  ;;  %v2616_v30 = vrot.slane %v5009_v44, 1 }
 0x175   : > { %v844_v49 = vor.u32 %v842_v55, %v841_v13  ;;  %v935_v22 = vsel %vm4429_vm8, %v841_v13, 0  ;;  %v1972_v8 = vsel %vm1447_vm5, %v1967_v62, %v1971_v42  ;;  %v5015_v55 = vld [vmem:[#allocation2 + $0x54] sm:$0xff]   ;;  %v2438_v62 = vshrl.u32 %v5009_v44, 16 }
 0x176   : > { %1841 = vrot.lane.b32.xlu0 %v4901_v21, %s4245_s26  ;;  %v3677_v0 = vcombine.low %v935_v22, %v935_v22  ;;  %v2424_v21 = vsel %vm1447_vm5, %v2419_v38, %v2423_v17  ;;  %v3006_v17 = vsel %vm3004_vm9, %v4142_v50, 0  ;;  %v2445_v42 = vshll.u32 %v4125_v7, 16 }
 0x177   : > { %2195 = vrot.lane.b32.xlu1 %v2154_v34, %s4246_s28  ;;  %v2431_v34 = vor.u32 %v2430_v33, %v2426_v57  ;;  %v919_v29 = vsel %vm4429_vm8, 0, %v844_v49  ;;  %v5026_v57 = vld [vmem:[#allocation2 + $0x54] sm:$0xff]   ;;  %v1694_v33 = vrot.slane %v5015_v55, 1  ;;  %3913 = vmatpush3.bf16.msra.mxu1 %v3006_v17  ;;  %v4124_v49 = vld [vmem:[#allocation2 + $0x68] ss:$0 sps:$4 sm:$0x11]  }
 0x178   : > { %v3675_v26 = vcombine.low %v919_v29, %v919_v29  ;;  %v3676_v56 = vcombine.high %v919_v29, %v919_v29  ;;  %1154 = vst.msk [vmem:[#allocation2 + $0x98] sm:$0x1] %vm1120_vm3, %v3677_v0  ;;  %v1535_v50 = vshll.u32 %v5015_v55, 16  ;;  %v2450_v17 = vshrl.u32 %v5006_v51, 16 }
 0x179   : > { %v2436_v14 = vsel %vm1447_vm5, %v2431_v34, %v2435_v18  ;;  %v1696_v4 = vsel %vm1672_vm4, %v1694_v33, %v1695_v20  ;;  %v2457_v33 = vshll.u32 %v5022_v3, 16  ;;  %v1988_v10 = vshll.u32 %v5026_v57, 16 }
 0x17a   : > { %2657 = vrot.lane.b32.xlu0 %v2615_v23, %s4247_s29  ;;  %1152 = vst.msk [vmem:[#allocation2 + $0x90] sm:$0xf] %vm1117_vm2, %v3675_v26  ;;  %1153 = vst.msk [vmem:[#allocation2 + $0x94] sm:$0xf] %vm1117_vm2, %v3676_v56  ;;  %v1698_v26 = vrot.slane %v4124_v49, 1  ;;  %v1545_v56 = vshrl.u32 %v5018_v63, 16 }
 0x17b   : > { %1731 = vrot.lane.b32.xlu1 %v1690_v9, %s4242_s12  ;;  %v3674_v9 = vcombine.low %v934_v37, %v934_v37  ;;  %v2617_v37 = vrot.slane %v4125_v7, 1 }
 0x17c   : > { %v4940_v31 = vpop.permute.xlu0 %2297 }
 0x17d   : > { %v4945_v27 = vpop.permute.xlu1 %1835  ;;  %1151 = vst.msk [vmem:[#allocation2 + $0x8c] sm:$0x1] %vm1120_vm3, %v3674_v9  ;;  %v2618_v46 = vsel %vm1672_vm4, %v2616_v30, %v2617_v37  ;;  %vm2971_vm3 = vcmask 293888  }
 0x17e   : > { %1733 = vrot.lane.b32.xlu0 %v1693_v45, %s4242_s12  ;;  %v3673_v45 = vcombine.high %v918_v5, %v918_v5 }
 0x17f   : > { %2115 = vrot.lane.b32.xlu1 %v1984_v25, %s4248_s30  ;;  %v3672_v25 = vcombine.low %v918_v5, %v918_v5 }
 0x180   : > { %v4956_v12 = vpop.permute.xlu0 %2321  ;;  %1150 = vst.msk [vmem:[#allocation2 + $0x88] sm:$0xf] %vm1117_vm2, %v3673_v45 }
 0x181   : > { %v4960_v61 = vpop.permute.xlu1 %1859  ;;  %1149 = vst.msk [vmem:[#allocation2 + $0x84] sm:$0xf] %vm1117_vm2, %v3672_v25  ;;  %v4126_v25 = vld [vmem:[#allocation2 + $0x5c] ss:$0 sps:$4 sm:$0x11]   ;;  %vm2911_vm2 = vcmask 261120  }
 0x182   : > { %2655 = vrot.lane.b32.xlu0 %v2612_v59, %s4247_s29  ;;  %v4118_v59 = vld [vmem:[#allocation2 + $0x68] ss:$0 sps:$4 sm:$0x11]  }
 0x183   : > { %1652 = vrot.lane.b32.xlu1 %v1531_v52, %s4243_s18  ;;  %v2159_v11 = vrot.slane %v4118_v59, 1  ;;  %v2619_v52 = vrot.slane %v5006_v51, 1  ;;  %v2005_v13 = vshll.u32 %v4118_v59, 16 }
 0x184   : > { %v4969_v54 = vpop.permute.xlu0 %1833 }
 0x185   : > { %v4974_v40 = vpop.permute.xlu1 %2319  ;;  %v2160_v22 = vsel %vm1672_vm4, %v2158_v16, %v2159_v11  ;;  %v2007_v34 = vrot.slane %v2005_v13, 1  ;;  %v2621_v29 = vsel %vm1672_vm4, %v2619_v52, %v2620_v32  ;;  %v2155_v11 = vrot.slane %v5026_v57, 1 }
 0x186   : > { %2193 = vrot.lane.b32.xlu0 %v2151_v60, %s4246_s28  ;;  %v1547_v60 = vshll.u32 %v5018_v63, 16  ;;  %v2156_v52 = vrot.slane %v4126_v25, 1  ;;  %v2447_v13 = vrot.slane %v2445_v42, 1  ;;  %v4130_v42 = vld [vmem:[#allocation2 + $0x80] ss:$0 sps:$4 sm:$0x11]  }
 0x187   : > { %2575 = vrot.lane.b32.xlu1 %v2424_v21, %s4249_s11  ;;  %v1552_v21 = vshll.u32 %v4124_v49, 16  ;;  %v2008_v9 = vsel %vm1447_vm5, %v2003_v24, %v2007_v34  ;;  %v2459_v24 = vrot.slane %v2457_v33, 1 }
 0x188   : > { %v4986_v23 = vpop.permute.xlu0 %1857  ;;  %v1549_v41 = vrot.slane %v1547_v60, 1  ;;  %v1540_v60 = vshll.u32 %v5011_v1, 16  ;;  %v2157_v3 = vsel %vm1672_vm4, %v2155_v11, %v2156_v52  ;;  %v5117_v52 = vld [vmem:[#allocation2 + $0x6c] sm:$0xff]  }
 0x189   : > { %v4988_v19 = vpop.permute.xlu1 %2187  ;;  %v1554_v59 = vrot.slane %v1552_v21, 1 }
 0x18a   : > { %2577 = vrot.lane.b32.xlu0 %v2436_v14, %s4249_s11  ;;  %v1699_v14 = vsel %vm1672_vm4, %v1697_v15, %v1698_v26  ;;  %v1993_v15 = vshll.u32 %v4126_v25, 16  ;;  %v1542_v1 = vrot.slane %v1540_v60, 1 }
 0x18b   : > { %1650 = vrot.lane.b32.xlu1 %v1519_v47, %s4243_s18  ;;  %v2452_v47 = vshll.u32 %v5006_v51, 16 }
 0x18c   : > { %v4997_v53 = vpop.permute.xlu0 %2649  ;;  %v1995_v37 = vrot.slane %v1993_v15, 1 }
 0x18d   : > { %v4999_v48 = vpop.permute.xlu1 %2211  ;;  %v2454_v20 = vrot.slane %v2452_v47, 1  ;;  %v4166_v47 = vld [vmem:[#allocation2] sm:$0xff]  }
 0x18e   : > { %2113 = vrot.lane.b32.xlu0 %v1972_v8, %s4248_s30  ;;  %v2442_v8 = vrot.slane %v2440_v28, 1 }
 0x18f   : > { %1847 = vrot.lane.b32.xlu1 %v4115_v2, %s4245_s26  ;;  %v1550_v2 = vor.u32 %v1549_v41, %v1545_v56 }
 0x190   : > { %v5013_v58 = vpop.permute.xlu0 %1725  ;;  %v2443_v49 = vor.u32 %v2442_v8, %v2438_v62 }
 0x191   : > { %v5020_v35 = vpop.permute.xlu1 %1723  ;;  %v1555_v32 = vsel %vm1447_vm5, %v1550_v2, %v1554_v59  ;;  %v2683_v2 = vsel %vm2681_vm10, %v4166_v47, %v4917_v39  ;;  %v5107_v59 = vld [vmem:[#allocation2 + $0x78] sm:$0xff]  }
 0x192   : > { %2309 = vrot.lane.b32.xlu0 %v5006_v51, %s4244_s25  ;;  %v2455_v51 = vor.u32 %v2454_v20, %v2450_v17  ;;  %v2448_v26 = vsel %vm1447_vm5, %v2443_v49, %v2447_v13  ;;  %v2715_v39 = vsel %vm499_vm1, %v2683_v2, %v4920_v43  ;;  %v2165_v17 = vrot.slane %v4130_v42, 1  ;;  %v5125_v20 = vld [vmem:[#allocation2 + $0x78] sm:$0xff]  }
 0x193   : > { %2307 = vrot.lane.b32.xlu1 %v5009_v44, %s4244_s25  ;;  %v1533_v44 = vshrl.u32 %v5015_v55, 16  ;;  %v2748_v43 = vsel %vm2746_vm11, %v2715_v39, %v4969_v54  ;;  %v1703_v2 = vrot.slane %v5125_v20, 1  ;;  %v1569_v39 = vshrl.u32 %v5125_v20, 16 }
 0x194   : > { %v5034_v36 = vpop.permute.xlu0 %2673  ;;  %v2460_v28 = vsel %vm1447_vm5, %v2455_v51, %v2459_v24  ;;  %v2029_v24 = vshll.u32 %v4130_v42, 16 }
 0x195   : > { %v5036_v38 = vpop.permute.xlu1 %1747 }
 0x196   : > { %1845 = vrot.lane.b32.xlu0 %v5026_v57, %s4245_s26 }
 0x197   : > { %2199 = vrot.lane.b32.xlu1 %v2160_v22, %s4246_s28  ;;  %v1537_v22 = vrot.slane %v1535_v50, 1  ;;  %v5111_v50 = vld [vmem:[#allocation2 + $0x74] ss:$0 sps:$4 sm:$0x11]  }
 0x198   : > { %v5044_v0 = vpop.permute.xlu0 %1749  ;;  %v1701_v60 = vrot.slane %v5111_v50, 1 }
 0x199   : > { %5703 = vst [vmem:[#allocation7_spill] sm:$0xff] %v5044_v0  ;;  %v5046_v18 = vpop.permute.xlu1 %2107  ;;  %v1538_v56 = vor.u32 %v1537_v22, %v1533_v44  ;;  %v5119_v44 = vld [vmem:[#allocation2 + $0x6c] sm:$0xff]  }
 0x19a   : > { %2661 = vrot.lane.b32.xlu0 %v2621_v29, %s4247_s29  ;;  %v1990_v29 = vrot.slane %v1988_v10, 1  ;;  %v1700_v10 = vrot.slane %v5119_v44, 1  ;;  %v5133_v22 = vld [vmem:[#allocation2 + $0x6c] sm:$0xff]  }
 0x19b   : > { %1735 = vrot.lane.b32.xlu1 %v1696_v4, %s4242_s12  ;;  %v1986_v4 = vshrl.u32 %v5026_v57, 16  ;;  %v1543_v57 = vsel %vm1447_vm5, %v1538_v56, %v1542_v1  ;;  %v1571_v1 = vshll.u32 %v5125_v20, 16 }
 0x19c   : > { %v5056_v5 = vpop.permute.xlu0 %2185 }
 0x19d   : > { %v5059_v45 = vpop.permute.xlu1 %1644  ;;  %v1991_v30 = vor.u32 %v1990_v29, %v1986_v4 }
 0x19e   : > { %1737 = vrot.lane.b32.xlu0 %v1699_v14, %s4242_s12  ;;  %v4127_v14 = vld [vmem:[#allocation2 + $0x78] sm:$0xff]  }
 0x19f   : > { %2119 = vrot.lane.b32.xlu1 %v2008_v9, %s4248_s30  ;;  %v1996_v62 = vsel %vm1447_vm5, %v1991_v30, %v1995_v37  ;;  %v2024_v33 = vshll.u32 %v4127_v14, 16  ;;  %v2164_v13 = vrot.slane %v4127_v14, 1  ;;  %v2022_v29 = vshrl.u32 %v4127_v14, 16  ;;  %v4137_v30 = vld [vmem:[#allocation2 + $0x74] ss:$0 sps:$4 sm:$0x11]  }
 0x1a0   : > { %v5068_v16 = vpop.permute.xlu0 %2671 }
 0x1a1   : > { %v5073_v6 = vpop.permute.xlu1 %2131  ;;  %v2026_v15 = vrot.slane %v2024_v33, 1  ;;  %v2166_v54 = vsel %vm1672_vm4, %v2164_v13, %v2165_v17  ;;  %v1573_v13 = vrot.slane %v1571_v1, 1 }
 0x1a2   : > { %2659 = vrot.lane.b32.xlu0 %v2618_v46, %s4247_s29  ;;  %v5113_v46 = vld [vmem:[#allocation2 + $0x80] ss:$0 sps:$4 sm:$0x11]  }
 0x1a3   : > { %1656 = vrot.lane.b32.xlu1 %v1555_v32, %s4243_s18  ;;  %v2625_v32 = vrot.slane %v5107_v59, 1 }
 0x1a4   : > { %v5081_v7 = vpop.permute.xlu0 %2209 }
 0x1a5   : > { %v5084_v34 = vpop.permute.xlu1 %1668 }
 0x1a6   : > { %2197 = vrot.lane.b32.xlu0 %v2157_v3, %s4246_s28  ;;  %v2626_v3 = vrot.slane %v5113_v46, 1 }
 0x1a7   : > { %2579 = vrot.lane.b32.xlu1 %v2448_v26, %s4249_s11  ;;  %v4136_v26 = vld [vmem:[#allocation2 + $0x80] ss:$0 sps:$4 sm:$0x11]  }
 0x1a8   : > { %v5090_v41 = vpop.permute.xlu0 %2569  ;;  %v1704_v33 = vrot.slane %v4136_v26, 1  ;;  %v1576_v17 = vshll.u32 %v4136_v26, 16 }
 0x1a9   : > { %v5092_v21 = vpop.permute.xlu1 %1839 }
 0x1aa   : > { %2581 = vrot.lane.b32.xlu0 %v2460_v28, %s4249_s11  ;;  %v1578_v26 = vrot.slane %v1576_v17, 1 }
 0x1ab   : > { %1654 = vrot.lane.b32.xlu1 %v1543_v57, %s4243_s18  ;;  %v1702_v57 = vsel %vm1672_vm4, %v1700_v10, %v1701_v60  ;;  %v2622_v10 = vrot.slane %v5117_v52, 1 }
 0x1ac   : > { %v5098_v9 = vpop.permute.xlu0 %2593 }
 0x1ad   : > { %v5100_v25 = vpop.permute.xlu1 %2591 }
 0x1ae   : > { %2117 = vrot.lane.b32.xlu0 %v1996_v62, %s4248_s30  ;;  %v2031_v62 = vrot.slane %v2029_v24, 1  ;;  %v1705_v24 = vsel %vm1672_vm4, %v1703_v2, %v1704_v33  ;;  %v2012_v33 = vshll.u32 %v5133_v22, 16 }
 0x1af   : > { %1851 = vrot.lane.b32.xlu1 %v4127_v14, %s4245_s26 }
 0x1b0   : > { %v5109_v8 = vpop.permute.xlu0 %1642 }
 0x1b1   : > { %v5115_v11 = vpop.permute.xlu1 %1666 }
 0x1b2   : > { %2313 = vrot.lane.b32.xlu0 %v5107_v59, %s4244_s25 }
 0x1b3   : > { %2311 = vrot.lane.b32.xlu1 %v5117_v52, %s4244_s25 }
 0x1b4   : > { %v2106_v49 = vpop.permute.xlu0 %2105 }
 0x1b5   : > { %v5137_v51 = vpop.permute.xlu1 %2299  ;;  %v2781_v4 = vsel %vm2779_vm12, %v2748_v43, %v2106_v49  ;;  %v2469_v43 = vshll.u32 %v4137_v30, 16  ;;  %v4138_v49 = vld [vmem:[#allocation2 + $0x74] ss:$0 sps:$4 sm:$0x11]  }
 0x1b6   : > { %v2814_v56 = vsel %vm2812_vm13, %v2781_v4, %v5056_v5  ;;  %1849 = vrot.lane.b32.xlu0 %v5133_v22, %s4245_s26  ;;  %v2627_v5 = vsel %vm1672_vm4, %v2625_v32, %v2626_v3  ;;  %v2623_v32 = vrot.slane %v4137_v30, 1  ;;  %v2462_v4 = vshrl.u32 %v5117_v52, 16 }
 0x1b7   : > { %v2847_v28 = vsel %vm2845_vm14, %v2814_v56, %v4940_v31  ;;  %2203 = vrot.lane.b32.xlu1 %v2166_v54, %s4246_s28  ;;  %v2027_v31 = vor.u32 %v2026_v15, %v2022_v29  ;;  %v2476_v29 = vshll.u32 %v5107_v59, 16  ;;  %v1574_v15 = vor.u32 %v1573_v13, %v1569_v39  ;;  %v4167_v39 = vld [vmem:[#allocation2 + $0xc] sm:$0xff]  }
 0x1b8   : > { %v5149_v37 = vpop.permute.xlu0 %2301  ;;  %v2880_v14 = vsel %vm2878_vm15, %v2847_v28, %v5090_v41  ;;  %v2464_v41 = vshll.u32 %v5117_v52, 16  ;;  %v1559_v54 = vshll.u32 %v5119_v44, 16  ;;  %v2624_v1 = vsel %vm1672_vm4, %v2622_v10, %v2623_v32 }
 0x1b9   : > { %v5155_v42 = vpop.permute.xlu1 %2323  ;;  %v2913_v47 = vsel %vm2911_vm2, %v2880_v14, %v4997_v53  ;;  %v2032_v3 = vsel %vm1447_vm5, %v2027_v31, %v2031_v62  ;;  %v2161_v28 = vrot.slane %v5133_v22, 1  ;;  %v1557_v52 = vshrl.u32 %v5119_v44, 16 }
 0x1ba   : > { %2665 = vrot.lane.b32.xlu0 %v2627_v5, %s4247_s29  ;;  %3914 = vmatprep.mubr.msk.bf16.mxu1 %vm2971_vm3, %v2913_v47  ;;  %v2466_v56 = vrot.slane %v2464_v41, 1  ;;  %v2162_v5 = vrot.slane %v4138_v49, 1  ;;  %v2481_v14 = vshll.u32 %v5113_v46, 16  ;;  %v1564_v47 = vshll.u32 %v5111_v50, 16 }
 0x1bb   : > { %1739 = vrot.lane.b32.xlu1 %v1702_v57, %s4242_s12  ;;  %v2471_v57 = vrot.slane %v2469_v43, 1  ;;  %v2474_v31 = vshrl.u32 %v5107_v59, 16  ;;  %v2478_v2 = vrot.slane %v2476_v29, 1  ;;  %v2685_v13 = vsel %vm2681_vm10, %v4167_v39, %v5109_v8 }
 0x1bc   : > { %v5166_v53 = vpop.permute.xlu0 %2129  ;;  %v1579_v17 = vsel %vm1447_vm5, %v1574_v15, %v1578_v26  ;;  %v2467_v41 = vor.u32 %v2466_v56, %v2462_v4  ;;  %v1561_v10 = vrot.slane %v1559_v54, 1  ;;  %v2163_v50 = vsel %vm1672_vm4, %v2161_v28, %v2162_v5  ;;  %v4141_v5 = vld [vmem:[#allocation2 + $0x90] sm:$0xff]  }
 0x1bd   : > { %v5168_v60 = vpop.permute.xlu1 %2191  ;;  %v2483_v59 = vrot.slane %v2481_v14, 1  ;;  %v2010_v32 = vshrl.u32 %v5133_v22, 16  ;;  %v2717_v43 = vsel %vm499_vm1, %v2685_v13, %v5020_v35  ;;  %v2479_v8 = vor.u32 %v2478_v2, %v2474_v31  ;;  %v4145_v31 = vld [vmem:[#allocation2 + $0x98] ss:$0 sps:$4 sm:$0x11]   ;;  %v5227_v13 = vld [vmem:[#allocation2 + $0x90] sm:$0xff]  }
 0x1be   : > { %1741 = vrot.lane.b32.xlu0 %v1705_v24, %s4242_s12  ;;  %v2014_v24 = vrot.slane %v2012_v33, 1  ;;  %v2017_v29 = vshll.u32 %v4138_v49, 16  ;;  %v2472_v4 = vsel %vm1447_vm5, %v2467_v41, %v2471_v57  ;;  %v1562_v15 = vor.u32 %v1561_v10, %v1557_v52  ;;  %v4168_v33 = vld [vmem:[#allocation2 + $0x9c] sm:$0xff]  }
 0x1bf   : > { %2123 = vrot.lane.b32.xlu1 %v2032_v3, %s4248_s30  ;;  %v1566_v26 = vrot.slane %v1564_v47, 1  ;;  %v2750_v56 = vsel %vm2746_vm11, %v2717_v43, %v4945_v27  ;;  %v2484_v35 = vsel %vm1447_vm5, %v2479_v8, %v2483_v59  ;;  %v2048_v2 = vshll.u32 %v4141_v5, 16  ;;  %v5240_v43 = vld [vmem:[#allocation2 + $0x8c] ss:$0 sps:$4 sm:$0x11]  }
 0x1c0   : > { %v5179_v30 = vpop.permute.xlu0 %1837  ;;  %v2019_v28 = vrot.slane %v2017_v29, 1  ;;  %v2783_v57 = vsel %vm2779_vm12, %v2750_v56, %v5046_v18  ;;  %v2709_v18 = vsel %vm2681_vm10, %v4168_v33, %v5115_v11  ;;  %v2171_v11 = vrot.slane %v4145_v31, 1  ;;  %v5252_v56 = vld [vmem:[#allocation2 + $0x84] sm:$0xff]  }
 0x1c1   : > { %v5183_v62 = vpop.permute.xlu1 %1727  ;;  %v1567_v49 = vsel %vm1447_vm5, %v1562_v15, %v1566_v26  ;;  %v2816_v47 = vsel %vm2812_vm13, %v2783_v57, %v4988_v19  ;;  %v5233_v19 = vld [vmem:[#allocation2 + $0x84] sm:$0xff]   ;;  %v2046_v8 = vshrl.u32 %v4141_v5, 16  ;;  %v2050_v29 = vrot.slane %v2048_v2, 1 }
 0x1c2   : > { %2663 = vrot.lane.b32.xlu0 %v2624_v1, %s4247_s29  ;;  %v2015_v1 = vor.u32 %v2014_v24, %v2010_v32  ;;  %v2849_v41 = vsel %vm2845_vm14, %v2816_v47, %v5137_v51  ;;  %v2170_v32 = vrot.slane %v4141_v5, 1  ;;  %v2741_v24 = vsel %vm499_vm1, %v2709_v18, %v5036_v38  ;;  %v5250_v26 = vld [vmem:[#allocation2 + $0x84] sm:$0xff]  }
 0x1c3   : > { %1660 = vrot.lane.b32.xlu1 %v1579_v17, %s4243_s18  ;;  %v5229_v17 = vld [vmem:[#allocation2 + $0x90] sm:$0xff]   ;;  %v2631_v38 = vrot.slane %v5227_v13, 1  ;;  %v2774_v57 = vsel %vm2746_vm11, %v2741_v24, %v4960_v61  ;;  %v1707_v47 = vrot.slane %v5240_v43, 1  ;;  %v2051_v2 = vor.u32 %v2050_v29, %v2046_v8 }
 0x1c4   : > { %v5193_v46 = vpop.permute.xlu0 %1861  ;;  %v2020_v14 = vsel %vm1447_vm5, %v2015_v1, %v2019_v28  ;;  %v1595_v1 = vshll.u32 %v5229_v17, 16  ;;  %v2488_v61 = vshll.u32 %v5233_v19, 16  ;;  %v1709_v24 = vrot.slane %v5229_v17, 1 }
 0x1c5   : > { %5704 = vst [vmem:[#allocation8_spill] sm:$0xff] %v5193_v46  ;;  %v5199_v3 = vpop.permute.xlu1 %1751  ;;  %v2628_v29 = vrot.slane %v5233_v19, 1 }
 0x1c6   : > { %2201 = vrot.lane.b32.xlu0 %v2163_v50, %s4246_s28  ;;  %v5235_v50 = vld [vmem:[#allocation2 + $0x98] ss:$0 sps:$4 sm:$0x11]   ;;  %v2490_v46 = vrot.slane %v2488_v61, 1 }
 0x1c7   : > { %2583 = vrot.lane.b32.xlu1 %v2472_v4, %s4249_s11  ;;  %v2053_v4 = vshll.u32 %v4145_v31, 16  ;;  %v4152_v31 = vld [vmem:[#allocation2 + $0x8c] ss:$0 sps:$4 sm:$0x11]  }
 0x1c8   : > { %v5206_v22 = vpop.permute.xlu0 %2653 }
 0x1c9   : > { %v5208_v54 = vpop.permute.xlu1 %2111  ;;  %v2055_v33 = vrot.slane %v2053_v4, 1  ;;  %v2629_v4 = vrot.slane %v4152_v31, 1 }
 0x1ca   : > { %2585 = vrot.lane.b32.xlu0 %v2484_v35, %s4249_s11  ;;  %v4151_v35 = vld [vmem:[#allocation2 + $0x98] ss:$0 sps:$4 sm:$0x11]  }
 0x1cb   : > { %1658 = vrot.lane.b32.xlu1 %v1567_v49, %s4243_s18  ;;  %v2632_v49 = vrot.slane %v5235_v50, 1 }
 0x1cc   : > { %v5216_v52 = vpop.permute.xlu0 %1729 }
 0x1cd   : > { %v5218_v27 = vpop.permute.xlu1 %1648 }
 0x1ce   : > { %2121 = vrot.lane.b32.xlu0 %v2020_v14, %s4248_s30  ;;  %v1706_v14 = vrot.slane %v5252_v56, 1 }
 0x1cf   : > { %1855 = vrot.lane.b32.xlu1 %v4141_v5, %s4245_s26  ;;  %v2172_v5 = vsel %vm1672_vm4, %v2170_v32, %v2171_v11  ;;  %v2633_v11 = vsel %vm1672_vm4, %v2631_v38, %v2632_v49  ;;  %v2486_v38 = vshrl.u32 %v5233_v19, 16  ;;  %v2493_v49 = vshll.u32 %v4152_v31, 16 }
 0x1d0   : > { %v2652_v39 = vpop.permute.xlu0 %2651  ;;  %v1708_v8 = vsel %vm1672_vm4, %v1706_v14, %v1707_v47 }
 0x1d1   : > { %v2572_v10 = vpop.permute.xlu1 %2571 }
 0x1d2   : > { %v2882_v59 = vsel %vm2878_vm15, %v2849_v41, %v2572_v10  ;;  %2317 = vrot.lane.b32.xlu0 %v5227_v13, %s4244_s25  ;;  %v1597_v41 = vrot.slane %v1595_v1, 1  ;;  %v1600_v10 = vshll.u32 %v4151_v35, 16  ;;  %v4169_v1 = vld [vmem:[#allocation2 + $0x18] sm:$0xff]  }
 0x1d3   : > { %v2915_v51 = vsel %vm2911_vm2, %v2882_v59, %v2652_v39  ;;  %2315 = vrot.lane.b32.xlu1 %v5233_v19, %s4244_s25  ;;  %v1593_v39 = vshrl.u32 %v5229_v17, 16  ;;  %v2807_v59 = vsel %vm2779_vm12, %v2774_v57, %v5073_v6  ;;  %v2056_v6 = vsel %vm1447_vm5, %v2051_v2, %v2055_v33  ;;  %v5283_v57 = vld [vmem:[#allocation2 + $0x8c] ss:$0 sps:$4 sm:$0x11]  }
 0x1d4   : > { %3915 = vmatmul.mubr.msk.bf16.vlgmr.msra.gmra.mrb[8].mxu1 %vm2971_vm3, %v2915_v51  ;;  %v5248_v15 = vpop.permute.xlu0 %2189  ;;  %v1710_v51 = vrot.slane %v4151_v35, 1  ;;  %v2840_v35 = vsel %vm2812_vm13, %v2807_v59, %v4999_v48  ;;  %v2167_v2 = vrot.slane %v5250_v26, 1  ;;  %v2500_v19 = vshll.u32 %v5227_v13, 16 }
 0x1d5   : > { %v5255_v28 = vpop.permute.xlu1 %1646  ;;  %v1598_v47 = vor.u32 %v1597_v41, %v1593_v39  ;;  %v2873_v0 = vsel %vm2845_vm14, %v2840_v35, %v5155_v42  ;;  %v2630_v48 = vsel %vm1672_vm4, %v2628_v29, %v2629_v4  ;;  %v1583_v39 = vshll.u32 %v5252_v56, 16 }
 0x1d6   : > { %1853 = vrot.lane.b32.xlu0 %v5250_v26, %s4245_s26  ;;  %v2495_v42 = vrot.slane %v2493_v49, 1  ;;  %v2168_v41 = vrot.slane %v5283_v57, 1  ;;  %v4170_v49 = vld [vmem:[#allocation2 + $0xb4] sm:$0xff]  }
 0x1d7   : > { %2207 = vrot.lane.b32.xlu1 %v2172_v5, %s4246_s28  ;;  %v2687_v5 = vsel %vm2681_vm10, %v4169_v1, %v5059_v45  ;;  %v2498_v1 = vshrl.u32 %v5227_v13, 16  ;;  %v1585_v35 = vrot.slane %v1583_v39, 1 }
 0x1d8   : > { %v2676_v18 = vpop.permute.xlu0 %2675  ;;  %v2719_v31 = vsel %vm499_vm1, %v2687_v5, %v5013_v58  ;;  %v2502_v5 = vrot.slane %v2500_v19, 1  ;;  %v2169_v13 = vsel %vm1672_vm4, %v2167_v2, %v2168_v41  ;;  %v4155_v41 = vld [vmem:[#allocation2 + $0xc8] ss:$0 sps:$4 sm:$0x11]  }
 0x1d9   : > { %v5271_v32 = vpop.permute.xlu1 %1843  ;;  %v2752_v58 = vsel %vm2746_vm11, %v2719_v31, %v5179_v30 }
 0x1da   : > { %2669 = vrot.lane.b32.xlu0 %v2633_v11, %s4247_s29  ;;  %v1602_v11 = vrot.slane %v1600_v10, 1  ;;  %v1581_v10 = vshrl.u32 %v5252_v56, 16  ;;  %v2503_v31 = vor.u32 %v2502_v5, %v2498_v1  ;;  %v2101_v5 = vshll.u32 %v4155_v41, 16 }
 0x1db   : > { %1743 = vrot.lane.b32.xlu1 %v1708_v8, %s4242_s12  ;;  %v1711_v8 = vsel %vm1672_vm4, %v1709_v24, %v1710_v51  ;;  %v2491_v24 = vor.u32 %v2490_v46, %v2486_v38  ;;  %v2505_v51 = vshll.u32 %v5235_v50, 16  ;;  %v1588_v46 = vshll.u32 %v5240_v43, 16  ;;  %v5316_v50 = vld [vmem:[#allocation2 + $0xc0] sm:$0xff]  }
 0x1dc   : > { %v2574_v14 = vpop.permute.xlu0 %2573  ;;  %v1603_v59 = vsel %vm1447_vm5, %v1598_v47, %v1602_v11  ;;  %v2034_v43 = vshrl.u32 %v5250_v26, 16 }
 0x1dd   : > { %v2596_v45 = vpop.permute.xlu1 %2595  ;;  %v2496_v39 = vsel %vm1447_vm5, %v2491_v24, %v2495_v42 }
 0x1de   : > { %v2906_v33 = vsel %vm2878_vm15, %v2873_v0, %v2596_v45  ;;  %1745 = vrot.lane.b32.xlu0 %v1711_v8, %s4242_s12  ;;  %v2507_v45 = vrot.slane %v2505_v51, 1  ;;  %v2041_v8 = vshll.u32 %v5283_v57, 16  ;;  %v2096_v57 = vshll.u32 %v5316_v50, 16 }
 0x1df   : > { %2127 = vrot.lane.b32.xlu1 %v2056_v6, %s4248_s30  ;;  %v5302_v61 = vsel %vm2911_vm2, %v2906_v33, %v2676_v18  ;;  %v2036_v6 = vshll.u32 %v5250_v26, 16  ;;  %v4156_v33 = vld [vmem:[#allocation2 + $0xbc] ss:$0 sps:$4 sm:$0x11]   ;;  %v1590_v26 = vrot.slane %v1588_v46, 1 }
 0x1e0   : > { %v2110_v0 = vpop.permute.xlu0 %2109  ;;  %v2508_v51 = vsel %vm1447_vm5, %v2503_v31, %v2507_v45  ;;  %v2098_v1 = vrot.slane %v2096_v57, 1  ;;  %v2180_v31 = vrot.slane %v4156_v33, 1 }
 0x1e1   : > { %v1671_v29 = vpop.permute.xlu1 %1670  ;;  %v2785_v4 = vsel %vm2779_vm12, %v2752_v58, %v2110_v0  ;;  %v2038_v2 = vrot.slane %v2036_v6, 1  ;;  %v4172_v6 = vld [vmem:[#allocation2 + $0x24] sm:$0xff]  }
 0x1e2   : > { %v2713_v18 = vsel %vm2681_vm10, %v4170_v49, %v1671_v29  ;;  %v2818_v30 = vsel %vm2812_vm13, %v2785_v4, %v5248_v15  ;;  %2667 = vrot.lane.b32.xlu0 %v2630_v48, %s4247_s29  ;;  %v4171_v48 = vld [vmem:[#allocation2 + $0xb4] sm:$0xff]   ;;  %v2089_v29 = vshll.u32 %v4156_v33, 16  ;;  %v2689_v49 = vsel %vm2681_vm10, %v4172_v6, %v5255_v28 }
 0x1e3   : > { %v2851_v38 = vsel %vm2845_vm14, %v2818_v30, %v5149_v37  ;;  %1664 = vrot.lane.b32.xlu1 %v1603_v59, %s4243_s18  ;;  %v5324_v47 = vsel %vm499_vm1, %v2713_v18, %v5199_v3  ;;  %v2084_v3 = vshll.u32 %v4171_v48, 16  ;;  %v2082_v0 = vshrl.u32 %v4171_v48, 16  ;;  %v5353_v30 = vld [vmem:[#allocation2 + $0xcc] sm:$0xff]  }
 0x1e4   : > { %v5326_v11 = vpop.permute.xlu0 %2305  ;;  %v2884_v15 = vsel %vm2878_vm15, %v2851_v38, %v2574_v14  ;;  %v1586_v14 = vor.u32 %v1585_v35, %v1581_v10  ;;  %v2039_v42 = vor.u32 %v2038_v2, %v2034_v43  ;;  %v2094_v10 = vshrl.u32 %v5316_v50, 16  ;;  %v4159_v2 = vld [vmem:[#allocation2 + $0xd4] ss:$0 sps:$4 sm:$0x11]  }
 0x1e5   : > { %v5331_v19 = vpop.permute.xlu1 %2303  ;;  %v2917_v37 = vsel %vm2911_vm2, %v2884_v15, %v5206_v22  ;;  %v2043_v22 = vrot.slane %v2041_v8, 1  ;;  %v2086_v24 = vrot.slane %v2084_v3, 1  ;;  %v5358_v15 = vld [vmem:[#allocation2 + $0xc0] sm:$0xff]   ;;  %v2103_v43 = vrot.slane %v2101_v5, 1 }
 0x1e6   : > { %2205 = vrot.lane.b32.xlu0 %v2169_v13, %s4246_s28  ;;  %3918 = vmatprep.mubr.msk.bf16.mxu1 %vm2971_vm3, %v2917_v37  ;;  %v1591_v4 = vsel %vm1447_vm5, %v1586_v14, %v1590_v26  ;;  %v2091_v13 = vrot.slane %v2089_v29, 1  ;;  %v2099_v45 = vor.u32 %v2098_v1, %v2094_v10  ;;  %v2721_v8 = vsel %vm499_vm1, %v2689_v49, %v5183_v62  ;;  %v4160_v26 = vld [vmem:[#allocation2 + $0xc8] ss:$0 sps:$4 sm:$0x11]  }
 0x1e7   : > { %2587 = vrot.lane.b32.xlu1 %v2496_v39, %s4249_s11  ;;  %v2044_v46 = vsel %vm1447_vm5, %v2039_v42, %v2043_v22  ;;  %v2087_v38 = vor.u32 %v2086_v24, %v2082_v0  ;;  %v2179_v37 = vrot.slane %v4171_v48, 1  ;;  %v2560_v3 = vshll.u32 %v5353_v30, 16 }
 0x1e8   : > { %v5340_v58 = vpop.permute.xlu0 %1841  ;;  %v2548_v57 = vshll.u32 %v5358_v15, 16  ;;  %v2754_v62 = vsel %vm2746_vm11, %v2721_v8, %v5092_v21  ;;  %v2104_v22 = vsel %vm1447_vm5, %v2099_v45, %v2103_v43  ;;  %v2182_v48 = vrot.slane %v5316_v50, 1 }
 0x1e9   : > { %v5342_v59 = vpop.permute.xlu1 %2195  ;;  %v2092_v14 = vsel %vm1447_vm5, %v2087_v38, %v2091_v13  ;;  %v2183_v33 = vrot.slane %v4155_v41, 1  ;;  %v2558_v42 = vshrl.u32 %v5353_v30, 16  ;;  %v2562_v24 = vrot.slane %v2560_v3, 1 }
 0x1ea   : > { %2589 = vrot.lane.b32.xlu0 %v2508_v51, %s4249_s11  ;;  %v2181_v51 = vsel %vm1672_vm4, %v2179_v37, %v2180_v31  ;;  %v2565_v29 = vshll.u32 %v4159_v2, 16  ;;  %v2546_v10 = vshrl.u32 %v5358_v15, 16  ;;  %v2550_v1 = vrot.slane %v2548_v57, 1 }
 0x1eb   : > { %1662 = vrot.lane.b32.xlu1 %v1591_v4, %s4243_s18  ;;  %v2787_v4 = vsel %vm2779_vm12, %v2754_v62, %v5208_v54  ;;  %v2553_v5 = vshll.u32 %v4160_v26, 16  ;;  %v2563_v49 = vor.u32 %v2562_v24, %v2558_v42  ;;  %v2646_v3 = vrot.slane %v5353_v30, 1 }
 0x1ec   : > { %v5351_v18 = vpop.permute.xlu0 %2657  ;;  %v2820_v41 = vsel %vm2812_vm13, %v2787_v4, %v5168_v60  ;;  %v2551_v13 = vor.u32 %v2550_v1, %v2546_v10  ;;  %v4173_v60 = vld [vmem:[#allocation2 + $0x30] sm:$0xff]   ;;  %v4174_v1 = vld [vmem:[#allocation2 + $0x3c] sm:$0xff]  }
 0x1ed   : > { %v5355_v35 = vpop.permute.xlu1 %1731  ;;  %v2853_v54 = vsel %vm2845_vm14, %v2820_v41, %v5331_v19  ;;  %v2555_v45 = vrot.slane %v2553_v5, 1  ;;  %v2691_v37 = vsel %vm2681_vm10, %v4173_v60, %v5218_v27 }
 0x1ee   : > { %2125 = vrot.lane.b32.xlu0 %v2044_v46, %s4248_s30  ;;  %v2567_v46 = vrot.slane %v2565_v29, 1 }
 0x1ef   : > { %1863 = vrot.lane.b32.xlu1 %v5316_v50, %s4245_s26  ;;  %v2184_v50 = vsel %vm1672_vm4, %v2182_v48, %v2183_v33  ;;  %v2556_v62 = vsel %vm1447_vm5, %v2551_v13, %v2555_v45  ;;  %v2644_v48 = vrot.slane %v4160_v26, 1  ;;  %v2723_v33 = vsel %vm499_vm1, %v2691_v37, %v5216_v52  ;;  %v4175_v37 = vld [vmem:[#allocation2 + $0x48] sm:$0xff]  }
 0x1f0   : > { %v5365_v28 = vpop.permute.xlu0 %1733  ;;  %v2568_v31 = vsel %vm1447_vm5, %v2563_v49, %v2567_v46  ;;  %v2756_v27 = vsel %vm2746_vm11, %v2723_v33, %v5340_v58 }
 0x1f1   : > { %v5368_v39 = vpop.permute.xlu1 %2115 }
 0x1f2   : > { %2133 = vrot.lane.b32.xlu0 %v2092_v14, %s4248_s30  ;;  %v2647_v14 = vrot.slane %v4159_v2, 1 }
 0x1f3   : > { %2135 = vrot.lane.b32.xlu1 %v2104_v22, %s4248_s30  ;;  %v2643_v22 = vrot.slane %v5358_v15, 1 }
 0x1f4   : > { %v2656_v0 = vpop.permute.xlu0 %2655 }
 0x1f5   : > { %v5382_v21 = vpop.permute.xlu1 %1652  ;;  %v2645_v42 = vsel %vm1672_vm4, %v2643_v22, %v2644_v48 }
 0x1f6   : > { %2213 = vrot.lane.b32.xlu0 %v2181_v51, %s4246_s28 }
 0x1f7   : > { %2215 = vrot.lane.b32.xlu1 %v2184_v50, %s4246_s28  ;;  %s4250_s28 = smov [#allocation4]  }
 0x1f8   : > { %v2194_v6 = vpop.permute.xlu0 %2193 }
 0x1f9   : > { %v2576_v38 = vpop.permute.xlu1 %2575 }
 0x1fa   : > { %v2886_v43 = vsel %vm2878_vm15, %v2853_v54, %v2576_v38  ;;  %2325 = vrot.lane.b32.xlu0 %v5358_v15, %s4244_s25 }
 0x1fb   : > { %2327 = vrot.lane.b32.xlu1 %v5353_v30, %s4244_s25  ;;  %v2919_v8 = vsel %vm2911_vm2, %v2886_v43, %v2656_v0  ;;  %v2648_v30 = vsel %vm1672_vm4, %v2646_v3, %v2647_v14  ;;  %s5637_s25 = scalar_lea.hbm %s5698_s10, %s3827_s20 }
 0x1fc   : > { %3919 = vmatmul.mubr.msk.bf16.gmra.mrb[12].mxu1 %vm2971_vm3, %v2919_v8  ;;  %v2578_v19 = vpop.permute.xlu0 %2577 }
 0x1fd   : > { %v1651_v57 = vpop.permute.xlu1 %1650 }
 0x1fe   : > { %2597 = vrot.lane.b32.xlu0 %v2556_v62, %s4249_s11  ;;  %v2693_v5 = vsel %vm2681_vm10, %v4174_v1, %v1651_v57 }
 0x1ff   : > { %2599 = vrot.lane.b32.xlu1 %v2568_v31, %s4249_s11  ;;  %s3826_s11 = sshll.u32 %s4363_s27, 5 }
 0x200   : > { %v2114_v0 = vpop.permute.xlu0 %2113  ;;  %s5568_s18 = scalar_lea.vmem %s5697_s9, %s3826_s11 }
 0x201   : > { %v1848_v2 = vpop.permute.xlu1 %1847  ;;  %v2789_v51 = vsel %vm2779_vm12, %v2756_v27, %v2114_v0 }
 0x202   : > { %v2822_v15 = vsel %vm2812_vm13, %v2789_v51, %v2194_v6  ;;  %2677 = vrot.lane.b32.xlu0 %v2645_v42, %s4247_s29 }
 0x203   : > { %v2855_v52 = vsel %vm2845_vm14, %v2822_v15, %v5326_v11  ;;  %2679 = vrot.lane.b32.xlu1 %v2648_v30, %s4247_s29  ;;  %v2725_v11 = vsel %vm499_vm1, %v2693_v5, %v5355_v35  ;;  %s365_s29 = sand.u32 1, %s4231_s14  }
 0x204   : > { %v2310_v26 = vpop.permute.xlu0 %2309  ;;  %v2888_v58 = vsel %vm2878_vm15, %v2855_v52, %v2578_v19  ;;  %v2758_v46 = vsel %vm2746_vm11, %v2725_v11, %v5271_v32  ;;  %v2695_v32 = vsel %vm2681_vm10, %v4175_v37, %v5382_v21  ;;  %s3604_s30 = sshll.u32 %s365_s29, 6  ;;  %s5646_s17 = scalar_lea.sflag [#allocation5], %s365_s29 }
 0x205   : > { %v2308_v24 = vpop.permute.xlu1 %2307  ;;  %v2921_v29 = vsel %vm2911_vm2, %v2888_v58, %v5351_v18  ;;  %v2791_v18 = vsel %vm2779_vm12, %v2758_v46, %v5368_v39  ;;  %v2727_v31 = vsel %vm499_vm1, %v2695_v32, %v5365_v28  ;;  %s367_s11 = scalar_lea.vmem [#allocation4], %s3604_s30  ;;  %s4181_s30 = sshll.u32 %s4250_s28, 4  ;;  %s4182_s30 = int_to_ptr.vmem [resolvable:$false] %s4181_s30 }
 0x206   : > { %3922 = vmatprep.mubr.msk.bf16.mxu1 %vm2971_vm3, %v2921_v29  ;;  %v2824_v13 = vsel %vm2812_vm13, %v2791_v18, %v5342_v59  ;;  %s3526_s21 = sshll.u32 %s367_s11, 4  ;;  %s4183_s20 = scalar_lea.vmem %s4182_s30, 2048  ;;  %s5640_s21 = int_to_ptr.vmem [resolvable:$true] %s3526_s21 }
 0x207   : > { %v2857_v43 = vsel %vm2845_vm14, %v2824_v13, %v2308_v24  ;;  %s4177_s26 = scalar_lea.vmem %s5640_s21, 1024  ;;  %p4184_p0 = scmp.lt.s32.totalorder %s5640_s21, %s4182_s30 }
 0x208   : > { %v1846_v4 = vpop.permute.xlu0 %1845  ;;  %p4178_p11 = scmp.ne.s32.totalorder %s5640_s21, %s4177_s26  ;;  %p4185_p1 = scmp.lt.s32.totalorder %s4183_s20, %s4177_s26 }
 0x209   : > { %v2200_v10 = vpop.permute.xlu1 %2199  ;;  %v2760_v59 = vsel %vm2746_vm11, %v2727_v31, %v1846_v4 }
 0x20a   : > { %p4179_p12 = pnand %p4178_p11, %p4345_p5  ;;  %p4186_p2 = por %p4185_p1, %p4184_p0 }
 0x20c   : > { %v2662_v50 = vpop.permute.xlu0 %2661  ;;  %p4180_p13 = pneg %p4179_p12 }
 0x20d   : > { %v1736_v41 = vpop.permute.xlu1 %1735 }
 0x20e   : > { %p4187_p3 = pnand %p4186_p2, %p4180_p13 }
 0x210   : > { %v1738_v6 = vpop.permute.xlu0 %1737 }
 0x211   : > { %v2120_v49 = vpop.permute.xlu1 %2119 }
 0x214   : > { %v2660_v54 = vpop.permute.xlu0 %2659 }
 0x215   : > { %v1657_v38 = vpop.permute.xlu1 %1656 }
 0x218   : > { %v2198_v45 = vpop.permute.xlu0 %2197 }
 0x219   : > { %v2580_v8 = vpop.permute.xlu1 %2579 }
 0x21a   : > { %v2890_v60 = vsel %vm2878_vm15, %v2857_v43, %v2580_v8 }
 0x21b   : > { %v2923_v35 = vsel %vm2911_vm2, %v2890_v60, %v2660_v54 }
 0x21c   : > { %3923 = vmatmul.mubr.msk.bf16.gmra.mrb[16].mxu1 %vm2971_vm3, %v2923_v35  ;;  %v2582_v19 = vpop.permute.xlu0 %2581 }
 0x21d   : > { %v1655_v39 = vpop.permute.xlu1 %1654 }
 0x21e   : > { %v2697_v30 = vsel %vm2681_vm10, %v5015_v55, %v1655_v39 }
 0x21f   : > { %v2729_v15 = vsel %vm499_vm1, %v2697_v30, %v1736_v41  ;;  %v2699_v41 = vsel %vm2681_vm10, %v5018_v63, %v1657_v38 }
 0x220   : > { %v2118_v3 = vpop.permute.xlu0 %2117 }
 0x221   : > { %v1852_v14 = vpop.permute.xlu1 %1851  ;;  %v2793_v57 = vsel %vm2779_vm12, %v2760_v59, %v2118_v3 }
 0x222   : > { %v2826_v62 = vsel %vm2812_vm13, %v2793_v57, %v2198_v45 }
 0x223   : > { %v2859_v22 = vsel %vm2845_vm14, %v2826_v62, %v2310_v26  ;;  %v2762_v26 = vsel %vm2746_vm11, %v2729_v15, %v1848_v2 }
 0x224   : > { %v2314_v48 = vpop.permute.xlu0 %2313  ;;  %v2892_v21 = vsel %vm2878_vm15, %v2859_v22, %v2582_v19  ;;  %v2795_v29 = vsel %vm2779_vm12, %v2762_v26, %v2120_v49  ;;  %v2731_v49 = vsel %vm499_vm1, %v2699_v41, %v1738_v6 }
 0x225   : > { %v2312_v33 = vpop.permute.xlu1 %2311  ;;  %v2925_v27 = vsel %vm2911_vm2, %v2892_v21, %v2662_v50  ;;  %v2828_v1 = vsel %vm2812_vm13, %v2795_v29, %v2200_v10 }
 0x226   : > { %3926 = vmatprep.mubr.msk.bf16.mxu1 %vm2971_vm3, %v2925_v27  ;;  %v2861_v50 = vsel %vm2845_vm14, %v2828_v1, %v2312_v33 }
 0x228   : > { %v1850_v0 = vpop.permute.xlu0 %1849 }
 0x229   : > { %v2204_v28 = vpop.permute.xlu1 %2203  ;;  %v2764_v18 = vsel %vm2746_vm11, %v2731_v49, %v1850_v0 }
 0x22c   : > { %v2666_v51 = vpop.permute.xlu0 %2665 }
 0x22d   : > { %v1740_v42 = vpop.permute.xlu1 %1739 }
 0x230   : > { %v1742_v52 = vpop.permute.xlu0 %1741 }
 0x231   : > { %v2124_v58 = vpop.permute.xlu1 %2123 }
 0x234   : > { %v2664_v24 = vpop.permute.xlu0 %2663 }
 0x235   : > { %v1661_v4 = vpop.permute.xlu1 %1660 }
 0x238   : > { %v2202_v5 = vpop.permute.xlu0 %2201 }
 0x239   : > { %v2584_v11 = vpop.permute.xlu1 %2583 }
 0x23a   : > { %v2894_v55 = vsel %vm2878_vm15, %v2861_v50, %v2584_v11 }
 0x23b   : > { %v2927_v46 = vsel %vm2911_vm2, %v2894_v55, %v2664_v24 }
 0x23c   : > { %3927 = vmatmul.mubr.msk.bf16.gmra.mrb[20].mxu1 %vm2971_vm3, %v2927_v46  ;;  %v2586_v2 = vpop.permute.xlu0 %2585 }
 0x23d   : > { %v1659_v54 = vpop.permute.xlu1 %1658 }
 0x23e   : > { %v2701_v32 = vsel %vm2681_vm10, %v5119_v44, %v1659_v54 }
 0x23f   : > { %v2733_v31 = vsel %vm499_vm1, %v2701_v32, %v1740_v42 }
 0x240   : > { %v2122_v10 = vpop.permute.xlu0 %2121  ;;  %v2766_v57 = vsel %vm2746_vm11, %v2733_v31, %v1852_v14 }
 0x241   : > { %v1856_v13 = vpop.permute.xlu1 %1855  ;;  %v2797_v45 = vsel %vm2779_vm12, %v2764_v18, %v2122_v10  ;;  %v2799_v22 = vsel %vm2779_vm12, %v2766_v57, %v2124_v58 }
 0x242   : > { %v2830_v43 = vsel %vm2812_vm13, %v2797_v45, %v2202_v5  ;;  %v2832_v27 = vsel %vm2812_vm13, %v2799_v22, %v2204_v28 }
 0x243   : > { %v2863_v8 = vsel %vm2845_vm14, %v2830_v43, %v2314_v48 }
 0x244   : > { %v2318_v60 = vpop.permute.xlu0 %2317  ;;  %v2896_v35 = vsel %vm2878_vm15, %v2863_v8, %v2586_v2  ;;  %v5705_v8 = vld [vmem:[#allocation7_spill] sm:$0xff] }
 0x245   : > { %v2316_v63 = vpop.permute.xlu1 %2315  ;;  %v2929_v38 = vsel %vm2911_vm2, %v2896_v35, %v2666_v51 }
 0x246   : > { %3930 = vmatprep.mubr.msk.bf16.mxu1 %vm2971_vm3, %v2929_v38  ;;  %v2865_v30 = vsel %vm2845_vm14, %v2832_v27, %v2316_v63 }
 0x248   : > { %v1854_v37 = vpop.permute.xlu0 %1853 }
 0x249   : > { %v2208_v6 = vpop.permute.xlu1 %2207 }
 0x24c   : > { %v2670_v19 = vpop.permute.xlu0 %2669 }
 0x24d   : > { %v1744_v39 = vpop.permute.xlu1 %1743 }
 0x250   : > { %v1746_v59 = vpop.permute.xlu0 %1745 }
 0x251   : > { %v2128_v3 = vpop.permute.xlu1 %2127 }
 0x254   : > { %v2668_v62 = vpop.permute.xlu0 %2667 }
 0x255   : > { %v1665_v48 = vpop.permute.xlu1 %1664 }
 0x256   : > { %v2707_v21 = vsel %vm2681_vm10, %v5229_v17, %v1665_v48  ;;  %v2703_v17 = vsel %vm2681_vm10, %v5125_v20, %v1661_v4  ;;  %v5546_v48 = vld [vmem:[%s5692_s4] ss:$0 sm:$0xff] }
 0x257   : > { %v2739_v33 = vsel %vm499_vm1, %v2707_v21, %v1746_v59  ;;  %v2735_v24 = vsel %vm499_vm1, %v2703_v17, %v1742_v52 }
 0x258   : > { %v2772_v44 = vsel %vm2746_vm11, %v2739_v33, %v4986_v23  ;;  %v2206_v0 = vpop.permute.xlu0 %2205 }
 0x259   : > { %v2588_v51 = vpop.permute.xlu1 %2587  ;;  %v2805_v42 = vsel %vm2779_vm12, %v2772_v44, %v5166_v53  ;;  %v2768_v53 = vsel %vm2746_vm11, %v2735_v24, %v1854_v37 }
 0x25a   : > { %v2898_v14 = vsel %vm2878_vm15, %v2865_v30, %v2588_v51  ;;  %v2838_v26 = vsel %vm2812_vm13, %v2805_v42, %v5081_v7 }
 0x25b   : > { %v2931_v15 = vsel %vm2911_vm2, %v2898_v14, %v2668_v62  ;;  %v3284_v62 = vld [vmem:[%s5693_s5] sm:$0x3] }
 0x25c   : > { %3931 = vmatmul.mubr.msk.bf16.gmra.mrb[24].mxu1 %vm2971_vm3, %v2931_v15  ;;  %v2590_v28 = vpop.permute.xlu0 %2589  ;;  %3995 = vmatprep.subr.msk.bf16.mxu0 %vm3004_vm9, %v3284_v62  ;;  %v3305_v22 = vsel %vm3004_vm9, %v3284_v62, 0 }
 0x25d   : > { %v1663_v58 = vpop.permute.xlu1 %1662  ;;  %3947 = vmatpush3.bf16.msra.mxu0 %v3305_v22 }
 0x25e   : > { %v2705_v23 = vsel %vm2681_vm10, %v5252_v56, %v1663_v58  ;;  %v2871_v56 = vsel %vm2845_vm14, %v2838_v26, %v4956_v12 }
 0x25f   : > { %v2737_v29 = vsel %vm499_vm1, %v2705_v23, %v1744_v39  ;;  %v2904_v54 = vsel %vm2878_vm15, %v2871_v56, %v5098_v9 }
 0x260   : > { %v2770_v1 = vsel %vm2746_vm11, %v2737_v29, %v1856_v13  ;;  %v2126_v5 = vpop.permute.xlu0 %2125  ;;  %v4176_v13 = vld [vmem:[#allocation2 + $0xa8] sm:$0xff]  }
 0x261   : > { %v2803_v20 = vsel %vm2779_vm12, %v2770_v1, %v2128_v3  ;;  %v1864_v4 = vpop.permute.xlu1 %1863  ;;  %v2801_v50 = vsel %vm2779_vm12, %v2768_v53, %v2126_v5  ;;  %v2711_v9 = vsel %vm2681_vm10, %v4176_v13, %v5084_v34 }
 0x262   : > { %v2834_v11 = vsel %vm2812_vm13, %v2801_v50, %v2206_v0  ;;  %v2836_v7 = vsel %vm2812_vm13, %v2803_v20, %v2208_v6  ;;  %v2778_v63 = vsel %vm2746_vm11, %v5324_v47, %v1864_v4 }
 0x263   : > { %v2867_v52 = vsel %vm2845_vm14, %v2834_v11, %v2318_v60  ;;  %v2869_v55 = vsel %vm2845_vm14, %v2836_v7, %v4974_v40  ;;  %v2937_v40 = vsel %vm2911_vm2, %v2904_v54, %v5034_v36  ;;  %v2743_v60 = vsel %vm499_vm1, %v2711_v9, %v5705_v8  ;;  %v3380_v7 = vld [vmem:[%s5695_s7] sm:$0xf] }
 0x264   : > { %v2134_v46 = vpop.permute.xlu0 %2133  ;;  %v2900_v41 = vsel %vm2878_vm15, %v2867_v52, %v2590_v28  ;;  %v2902_v2 = vsel %vm2878_vm15, %v2869_v55, %v5100_v25  ;;  %3996 = vmatprep.subr.msk.bf16.mxu0 %vm548_vm0, %v3380_v7 }
 0x265   : > { %v2136_v49 = vpop.permute.xlu1 %2135  ;;  %v2933_v12 = vsel %vm2911_vm2, %v2900_v41, %v2670_v19  ;;  %v2935_v18 = vsel %vm2911_vm2, %v2902_v2, %v5068_v16  ;;  %v5706_v16 = vld [vmem:[#allocation8_spill] sm:$0xff] }
 0x266   : > { %3934 = vmatprep.mubr.msk.bf16.mxu1 %vm2971_vm3, %v2933_v12  ;;  %v2776_v35 = vsel %vm2746_vm11, %v2743_v60, %v5706_v16  ;;  %v2811_v34 = vsel %vm2779_vm12, %v2778_v63, %v2136_v49 }
 0x267   : > { %3935 = vmatmul.mubr.msk.bf16.gmra.mrb[28].mxu1 %vm2971_vm3, %v2935_v18  ;;  %v2809_v38 = vsel %vm2779_vm12, %v2776_v35, %v2134_v46 }
 0x268   : > { %3938 = vmatprep.mubr.msk.bf16.mxu1 %vm2971_vm3, %v2937_v40  ;;  %v2214_v10 = vpop.permute.xlu0 %2213 }
 0x269   : > { %v2216_v25 = vpop.permute.xlu1 %2215  ;;  %v2842_v6 = vsel %vm2812_vm13, %v2809_v38, %v2214_v10 }
 0x26a   : > { %v2844_v32 = vsel %vm2812_vm13, %v2811_v34, %v2216_v25 }
 0x26c   : > { %v2326_v45 = vpop.permute.xlu0 %2325 }
 0x26d   : > { %v2328_v43 = vpop.permute.xlu1 %2327  ;;  %v2875_v19 = vsel %vm2845_vm14, %v2842_v6, %v2326_v45 }
 0x26f   : > { %3939 = vmatmul.mubr.msk.bf16.gmra.mrb[32].mxu1 %vm2971_vm3, %v5302_v61  ;;  %v2877_v61 = vsel %vm2845_vm14, %v2844_v32, %v2328_v43 }
 0x270   : > { %v2598_v36 = vpop.permute.xlu0 %2597 }
 0x271   : > { %v2600_v37 = vpop.permute.xlu1 %2599  ;;  %v2908_v39 = vsel %vm2878_vm15, %v2875_v19, %v2598_v36 }
 0x272   : > { %v2910_v59 = vsel %vm2878_vm15, %v2877_v61, %v2600_v37 }
 0x274   : > { %v2678_v31 = vpop.permute.xlu0 %2677 }
 0x275   : > { %v2680_v3 = vpop.permute.xlu1 %2679  ;;  %v2941_v47 = vsel %vm2911_vm2, %v2908_v39, %v2678_v31 }
 0x276   : > { %v2943_v57 = vsel %vm2911_vm2, %v2910_v59, %v2680_v3  ;;  %3942 = vmatprep.mubr.msk.bf16.mxu1 %vm2971_vm3, %v2941_v47 }
 0x277   : > { %3943 = vmatmul.mubr.msk.bf16.gmra.mrb[36].mxu1 %vm2971_vm3, %v2943_v57 }
 0x2a7   : > { %v3916_v21 = vpop.f32.mrb[8].mxu1 }
 0x2a8   : > { %v3051_v33 = vadd.f32 %v3916_v21, %v5546_v48  ;;  %v3042_v27 = vpop.f32.mrb[9].mxu1 }
 0x2a9   : > { %v3043_v44 = vadd.f32 %v5546_v48, %v3042_v27  ;;  %v3917_v0 = vpop.f32.mrb[10].mxu1 }
 0x2aa   : > { %v3171_v30 = vmax.f32 %v3051_v33, 0.0  ;;  %v3054_v51 = vadd.f32 %v3917_v0, %v5546_v48  ;;  %v3045_v14 = vpop.f32.mrb[11].mxu1 }
 0x2ab   : > { %v3169_v42 = vmax.f32 %v3043_v44, 0.0  ;;  %v3046_v15 = vadd.f32 %v5546_v48, %v3045_v14 }
 0x2ac   : > { %v3172_v17 = vmax.f32 %v3054_v51, 0.0 }
 0x2ad   : > { %v3201_v28 = vadd.f32 %v3171_v30, %v3169_v42  ;;  %v3170_v58 = vmax.f32 %v3046_v15, 0.0 }
 0x2af   : > { %3217 = vst.msk [vmem:[#allocation3] sm:$0xff] %vm2681_vm10, %v3201_v28  ;;  %v3202_v23 = vadd.f32 %v3172_v17, %v3170_v58  ;;  %v3421_v58 = vsel %vm548_vm0, %v3380_v7, 0 }
 0x2b1   : > { %3218 = vst.msk [vmem:[#allocation3 + $0x8] sm:$0xff] %vm2681_vm10, %v3202_v23 }
 0x2b8   : > { %v3233_v41 = vld [vmem:[#allocation3] ss:$2 sm:$0xff]  ;;  %v3249_v2 = vld [vmem:[#allocation3 + $0x1] ss:$2 sm:$0xff] }
 0x2b9   : > { %v3264_v54 = vadd.f32 %v3249_v2, %v3233_v41 }
 0x2bb   : > { %v3272_v40 = vmul.f32 0.25, %v3264_v54 }
 0x2cf   : > { %v3920_v26 = vpop.f32.mrb[12].mxu1 }
 0x2d0   : > { %v3067_v24 = vadd.f32 %v3920_v26, %v5546_v48  ;;  %v3058_v29 = vpop.f32.mrb[13].mxu1 }
 0x2d1   : > { %v3059_v53 = vadd.f32 %v5546_v48, %v3058_v29  ;;  %v3921_v1 = vpop.f32.mrb[14].mxu1 }
 0x2d2   : > { %v3175_v5 = vmax.f32 %v3067_v24, 0.0  ;;  %v3070_v20 = vadd.f32 %v3921_v1, %v5546_v48  ;;  %v3061_v4 = vpop.f32.mrb[15].mxu1 }
 0x2d3   : > { %v3173_v50 = vmax.f32 %v3059_v53, 0.0  ;;  %v3062_v56 = vadd.f32 %v5546_v48, %v3061_v4 }
 0x2d4   : > { %v3176_v11 = vmax.f32 %v3070_v20, 0.0 }
 0x2d5   : > { %v3203_v52 = vadd.f32 %v3175_v5, %v3173_v50  ;;  %v3174_v55 = vmax.f32 %v3062_v56, 0.0 }
 0x2d7   : > { %3219 = vst.msk [vmem:[#allocation3 + $0x10] sm:$0xff] %vm2681_vm10, %v3203_v52  ;;  %v3204_v46 = vadd.f32 %v3176_v11, %v3174_v55 }
 0x2d9   : > { %3220 = vst.msk [vmem:[#allocation3 + $0x18] sm:$0xff] %vm2681_vm10, %v3204_v46 }
 0x2e0   : > { %v3235_v49 = vld [vmem:[#allocation3 + $0x10] ss:$2 sm:$0xff]  ;;  %v3251_v12 = vld [vmem:[#allocation3 + $0x11] ss:$2 sm:$0xff] }
 0x2e1   : > { %v3265_v18 = vadd.f32 %v3251_v12, %v3235_v49 }
 0x2e3   : > { %v3273_v10 = vmul.f32 0.25, %v3265_v18 }
 0x2e5   : > { %v3280_v25 = vpack.c.bf16 %v3273_v10, %v3272_v40 }
 0x2e7   : > { %3948 = vmatprep.mubr.msk.bf16.mxu0 %vm2681_vm10, %v3280_v25 }
 0x2ef   : > { %v3924_v13 = vpop.f32.mrb[16].mxu1 }
 0x2f0   : > { %v3083_v9 = vadd.f32 %v3924_v13, %v5546_v48  ;;  %v3074_v45 = vpop.f32.mrb[17].mxu1 }
 0x2f1   : > { %v3075_v43 = vadd.f32 %v5546_v48, %v3074_v45  ;;  %v3925_v8 = vpop.f32.mrb[18].mxu1 }
 0x2f2   : > { %v3179_v60 = vmax.f32 %v3083_v9, 0.0  ;;  %v3086_v16 = vadd.f32 %v3925_v8, %v5546_v48  ;;  %v3077_v35 = vpop.f32.mrb[19].mxu1 }
 0x2f3   : > { %v3177_v36 = vmax.f32 %v3075_v43, 0.0  ;;  %v3078_v63 = vadd.f32 %v5546_v48, %v3077_v35 }
 0x2f4   : > { %v3180_v38 = vmax.f32 %v3086_v16, 0.0 }
 0x2f5   : > { %v3205_v37 = vadd.f32 %v3179_v60, %v3177_v36  ;;  %v3178_v34 = vmax.f32 %v3078_v63, 0.0 }
 0x2f7   : > { %3221 = vst.msk [vmem:[#allocation3 + $0x20] sm:$0xff] %vm2681_vm10, %v3205_v37  ;;  %v3206_v6 = vadd.f32 %v3180_v38, %v3178_v34 }
 0x2f9   : > { %3222 = vst.msk [vmem:[#allocation3 + $0x28] sm:$0xff] %vm2681_vm10, %v3206_v6 }
 0x300   : > { %v3237_v44 = vld [vmem:[#allocation3 + $0x20] ss:$2 sm:$0xff]  ;;  %v3253_v0 = vld [vmem:[#allocation3 + $0x21] ss:$2 sm:$0xff] }
 0x301   : > { %v3266_v30 = vadd.f32 %v3253_v0, %v3237_v44 }
 0x303   : > { %v3274_v15 = vmul.f32 0.25, %v3266_v30 }
 0x30f   : > { %v3928_v32 = vpop.f32.mrb[20].mxu1 }
 0x310   : > { %v3099_v19 = vadd.f32 %v3928_v32, %v5546_v48  ;;  %v3090_v61 = vpop.f32.mrb[21].mxu1 }
 0x311   : > { %v3091_v39 = vadd.f32 %v5546_v48, %v3090_v61  ;;  %v3929_v31 = vpop.f32.mrb[22].mxu1 }
 0x312   : > { %v3183_v59 = vmax.f32 %v3099_v19, 0.0  ;;  %v3102_v3 = vadd.f32 %v3929_v31, %v5546_v48  ;;  %v3093_v47 = vpop.f32.mrb[23].mxu1 }
 0x313   : > { %v3181_v57 = vmax.f32 %v3091_v39, 0.0  ;;  %v3094_v62 = vadd.f32 %v5546_v48, %v3093_v47 }
 0x314   : > { %v3184_v22 = vmax.f32 %v3102_v3, 0.0 }
 0x315   : > { %v3207_v21 = vadd.f32 %v3183_v59, %v3181_v57  ;;  %v3182_v33 = vmax.f32 %v3094_v62, 0.0 }
 0x317   : > { %3223 = vst.msk [vmem:[#allocation3 + $0x30] sm:$0xff] %vm2681_vm10, %v3207_v21  ;;  %v3208_v27 = vadd.f32 %v3184_v22, %v3182_v33 }
 0x319   : > { %3224 = vst.msk [vmem:[#allocation3 + $0x38] sm:$0xff] %vm2681_vm10, %v3208_v27 }
 0x320   : > { %v3239_v51 = vld [vmem:[#allocation3 + $0x30] ss:$2 sm:$0xff]  ;;  %v3255_v14 = vld [vmem:[#allocation3 + $0x31] ss:$2 sm:$0xff] }
 0x321   : > { %v3267_v42 = vadd.f32 %v3255_v14, %v3239_v51 }
 0x323   : > { %v3275_v17 = vmul.f32 0.25, %v3267_v42 }
 0x325   : > { %v3281_v28 = vpack.c.bf16 %v3275_v17, %v3274_v15 }
 0x327   : > { %3949 = vmatmul.mubr.msk.bf16.vlgmr.msra.gmra.mrb[24].mxu0 %vm2681_vm10, %v3281_v28 }
 0x328   : > { %3957 = vmatpush3.bf16.msra.mxu0 %v3421_v58 }
 0x32f   : > { %v3932_v23 = vpop.f32.mrb[24].mxu1 }
 0x330   : > { %v3115_v26 = vadd.f32 %v3932_v23, %v5546_v48  ;;  %v3106_v24 = vpop.f32.mrb[25].mxu1 }
 0x331   : > { %v3107_v29 = vadd.f32 %v5546_v48, %v3106_v24  ;;  %v3933_v53 = vpop.f32.mrb[26].mxu1 }
 0x332   : > { %v3187_v1 = vmax.f32 %v3115_v26, 0.0  ;;  %v3118_v5 = vadd.f32 %v3933_v53, %v5546_v48  ;;  %v3109_v20 = vpop.f32.mrb[27].mxu1 }
 0x333   : > { %v3185_v4 = vmax.f32 %v3107_v29, 0.0  ;;  %v3110_v50 = vadd.f32 %v5546_v48, %v3109_v20 }
 0x334   : > { %v3188_v56 = vmax.f32 %v3118_v5, 0.0 }
 0x335   : > { %v3209_v11 = vadd.f32 %v3187_v1, %v3185_v4  ;;  %v3186_v7 = vmax.f32 %v3110_v50, 0.0  ;;  %v4161_v50 = vld [vmem:[%s5568_s18] sm:$0xff]  }
 0x337   : > { %3225 = vst.msk [vmem:[#allocation3 + $0x40] sm:$0xff] %vm2681_vm10, %v3209_v11  ;;  %v3210_v52 = vadd.f32 %v3188_v56, %v3186_v7  ;;  %v4162_v11 = vld [vmem:[%s5568_s18 + $0x8] sm:$0xff]   ;;  %v4163_v7 = vld [vmem:[%s5568_s18 + $0x10] sm:$0xff]  }
 0x339   : > { %3226 = vst.msk [vmem:[#allocation3 + $0x48] sm:$0xff] %vm2681_vm10, %v3210_v52  ;;  %v4164_v52 = vld [vmem:[%s5568_s18 + $0x18] sm:$0xff]  }
 0x33a   : > { %v3936_v55 = vpop.f32.mrb[28].mxu1 }
 0x33b   : > { %v3131_v46 = vadd.f32 %v3936_v55, %v5546_v48  ;;  %v3122_v41 = vpop.f32.mrb[29].mxu1  ;;  %v3806_v55 = vld [vmem:[%s5694_s6] ss:$0 sm:$0xff] }
 0x33c   : > { %v3123_v2 = vadd.f32 %v5546_v48, %v3122_v41  ;;  %v3937_v54 = vpop.f32.mrb[30].mxu1 }
 0x33d   : > { %v3191_v49 = vmax.f32 %v3131_v46, 0.0  ;;  %v3134_v12 = vadd.f32 %v3937_v54, %v5546_v48  ;;  %v3125_v18 = vpop.f32.mrb[31].mxu1  ;;  %v3811_v46 = vld [vmem:[%s5696_s8] ss:$0 sm:$0xff] }
 0x33e   : > { %v3189_v40 = vmax.f32 %v3123_v2, 0.0  ;;  %v3126_v10 = vadd.f32 %v5546_v48, %v3125_v18  ;;  %v3974_v41 = vadd.f32 %v3811_v46, %v3806_v55 }
 0x33f   : > { %v3192_v25 = vmax.f32 %v3134_v12, 0.0 }
 0x340   : > { %v3211_v13 = vadd.f32 %v3191_v49, %v3189_v40  ;;  %v3190_v9 = vmax.f32 %v3126_v10, 0.0  ;;  %v3241_v32 = vld [vmem:[#allocation3 + $0x40] ss:$2 sm:$0xff]  ;;  %v3257_v19 = vld [vmem:[#allocation3 + $0x41] ss:$2 sm:$0xff] }
 0x341   : > { %v3268_v3 = vadd.f32 %v3257_v19, %v3241_v32 }
 0x342   : > { %3227 = vst.msk [vmem:[#allocation3 + $0x50] sm:$0xff] %vm2681_vm10, %v3211_v13  ;;  %v3212_v45 = vadd.f32 %v3192_v25, %v3190_v9  ;;  %v3940_v43 = vpop.f32.mrb[32].mxu1 }
 0x343   : > { %v3147_v8 = vadd.f32 %v3940_v43, %v5546_v48  ;;  %v3138_v60 = vpop.f32.mrb[33].mxu1  ;;  %v3276_v42 = vmul.f32 0.25, %v3268_v3 }
 0x344   : > { %3228 = vst.msk [vmem:[#allocation3 + $0x58] sm:$0xff] %vm2681_vm10, %v3212_v45  ;;  %v3139_v16 = vadd.f32 %v5546_v48, %v3138_v60  ;;  %v3941_v35 = vpop.f32.mrb[34].mxu1 }
 0x345   : > { %v3195_v36 = vmax.f32 %v3147_v8, 0.0  ;;  %v3150_v63 = vadd.f32 %v3941_v35, %v5546_v48  ;;  %v3141_v38 = vpop.f32.mrb[35].mxu1 }
 0x346   : > { %v3193_v37 = vmax.f32 %v3139_v16, 0.0  ;;  %v3142_v34 = vadd.f32 %v5546_v48, %v3141_v38 }
 0x347   : > { %v3196_v6 = vmax.f32 %v3150_v63, 0.0 }
 0x348   : > { %v3213_v61 = vadd.f32 %v3195_v36, %v3193_v37  ;;  %v3194_v39 = vmax.f32 %v3142_v34, 0.0 }
 0x34a   : > { %3229 = vst.msk [vmem:[#allocation3 + $0x60] sm:$0xff] %vm2681_vm10, %v3213_v61  ;;  %v3214_v31 = vadd.f32 %v3196_v6, %v3194_v39  ;;  %v3944_v59 = vpop.f32.mrb[36].mxu1 }
 0x34b   : > { %v3163_v47 = vadd.f32 %v3944_v59, %v5546_v48  ;;  %v3154_v57 = vpop.f32.mrb[37].mxu1  ;;  %v3243_v62 = vld [vmem:[#allocation3 + $0x50] ss:$2 sm:$0xff]  ;;  %v3259_v22 = vld [vmem:[#allocation3 + $0x51] ss:$2 sm:$0xff] }
 0x34c   : > { %3230 = vst.msk [vmem:[#allocation3 + $0x68] sm:$0xff] %vm2681_vm10, %v3214_v31  ;;  %v3155_v21 = vadd.f32 %v5546_v48, %v3154_v57  ;;  %v3945_v33 = vpop.f32.mrb[38].mxu1  ;;  %v3269_v27 = vadd.f32 %v3259_v22, %v3243_v62 }
 0x34d   : > { %v3199_v44 = vmax.f32 %v3163_v47, 0.0  ;;  %v3166_v0 = vadd.f32 %v3945_v33, %v5546_v48  ;;  %v3157_v30 = vpop.f32.mrb[39].mxu1 }
 0x34e   : > { %v3197_v51 = vmax.f32 %v3155_v21, 0.0  ;;  %v3158_v14 = vadd.f32 %v5546_v48, %v3157_v30  ;;  %v3277_v15 = vmul.f32 0.25, %v3269_v27 }
 0x34f   : > { %v3200_v17 = vmax.f32 %v3166_v0, 0.0 }
 0x350   : > { %v3215_v28 = vadd.f32 %v3199_v44, %v3197_v51  ;;  %v3198_v58 = vmax.f32 %v3158_v14, 0.0  ;;  %v3282_v23 = vpack.c.bf16 %v3277_v15, %v3276_v42 }
 0x352   : > { %3231 = vst.msk [vmem:[#allocation3 + $0x70] sm:$0xff] %vm2681_vm10, %v3215_v28  ;;  %v3216_v26 = vadd.f32 %v3200_v17, %v3198_v58  ;;  %3952 = vmatprep.mubr.msk.bf16.mxu0 %vm2681_vm10, %v3282_v23 }
 0x353   : > { %v3245_v24 = vld [vmem:[#allocation3 + $0x60] ss:$2 sm:$0xff]  ;;  %v3261_v29 = vld [vmem:[#allocation3 + $0x61] ss:$2 sm:$0xff] }
 0x354   : > { %3232 = vst.msk [vmem:[#allocation3 + $0x78] sm:$0xff] %vm2681_vm10, %v3216_v26  ;;  %v3270_v48 = vadd.f32 %v3261_v29, %v3245_v24 }
 0x356   : > { %v3278_v20 = vmul.f32 0.25, %v3270_v48 }
 0x35b   : > { %v3247_v53 = vld [vmem:[#allocation3 + $0x70] ss:$2 sm:$0xff]  ;;  %v3263_v1 = vld [vmem:[#allocation3 + $0x71] ss:$2 sm:$0xff] }
 0x35c   : > { %v3271_v5 = vadd.f32 %v3263_v1, %v3247_v53 }
 0x35e   : > { %v3279_v4 = vmul.f32 0.25, %v3271_v5 }
 0x360   : > { %v3283_v56 = vpack.c.bf16 %v3279_v4, %v3278_v20 }
 0x362   : > { %3953 = vmatmul.mubr.msk.bf16.gmra.mrb[28].mxu0 %vm2681_vm10, %v3283_v56 }
 0x363   : > { %3958 = vmatprep.mubr.msk.bf16.mxu0 %vm499_vm1, %v4161_v50 }
 0x36a   : > { %3959 = vmatmul.mubr.msk.bf16.vlgmr.msra.gmra.mrb[24].mxu0 %vm499_vm1, %v4162_v11 }
 0x36b   : > { %3962 = vmatprep.mubr.msk.bf16.mxu0 %vm499_vm1, %v4163_v7 }
 0x372   : > { %3963 = vmatmul.mubr.msk.bf16.gmra.mrb[28].mxu0 %vm499_vm1, %v4164_v52 }
 0x43d   : > { %v3960_v2 = vpop.f32.mrb[24].mxu0 }
 0x43e   : > { %v3968_v54 = vadd.f32 %v3960_v2, %v3806_v55  ;;  %v3457_v49 = vpop.f32.mrb[25].mxu0 }
 0x43f   : > { %v3970_v12 = vadd.f32 %v3806_v55, %v3457_v49  ;;  %v3961_v18 = vpop.f32.mrb[26].mxu0 }
 0x440   : > { %v3969_v40 = vadd.f32 %v3968_v54, %v3811_v46  ;;  %v3973_v10 = vadd.f32 %v3974_v41, %v3961_v18  ;;  %v3460_v25 = vpop.f32.mrb[27].mxu0 }
 0x441   : > { %v3971_v13 = vadd.f32 %v3970_v12, %v3811_v46  ;;  %v3975_v9 = vadd.f32 %v3974_v41, %v3460_v25 }
 0x442   : > { %v3498_v45 = vmax.f32 %v3969_v40, 0.0  ;;  %v3499_v43 = vmax.f32 %v3973_v10, 0.0 }
 0x443   : > { %v3496_v8 = vmax.f32 %v3971_v13, 0.0  ;;  %v3497_v60 = vmax.f32 %v3975_v9, 0.0 }
 0x444   : > { %3506 = vst.msk [vmem:[%s367_s11 + $0x10] sm:$0xff] %vm2779_vm12, %v3498_v45  ;;  %3507 = vst.msk [vmem:[%s367_s11 + $0x18] sm:$0xff] %vm2779_vm12, %v3499_v43 }
 0x445   : > { %3504 = vst.msk [vmem:[%s367_s11] sm:$0xff] %vm2779_vm12, %v3496_v8  ;;  %3505 = vst.msk [vmem:[%s367_s11 + $0x8] sm:$0xff] %vm2779_vm12, %v3497_v60  ;;  %v3964_v16 = vpop.f32.mrb[28].mxu0 }
 0x446   : > { %v3977_v35 = vadd.f32 %v3974_v41, %v3964_v16  ;;  %v3473_v36 = vpop.f32.mrb[29].mxu0 }
 0x447   : > { %v3979_v63 = vadd.f32 %v3974_v41, %v3473_v36  ;;  %v3965_v38 = vpop.f32.mrb[30].mxu0 }
 0x448   : > { %v3502_v37 = vmax.f32 %v3977_v35, 0.0  ;;  %v3981_v34 = vadd.f32 %v3974_v41, %v3965_v38  ;;  %v3476_v6 = vpop.f32.mrb[31].mxu0 }
 0x449   : > { %v3500_v32 = vmax.f32 %v3979_v63, 0.0  ;;  %v3983_v19 = vadd.f32 %v3974_v41, %v3476_v6 }
 0x44a   : > { %3510 = vst.msk [vmem:[%s367_s11 + $0x30] sm:$0xff] %vm2779_vm12, %v3502_v37  ;;  %v3503_v61 = vmax.f32 %v3981_v34, 0.0 }
 0x44b   : > { %3508 = vst.msk [vmem:[%s367_s11 + $0x20] sm:$0xff] %vm2779_vm12, %v3500_v32  ;;  %v3501_v39 = vmax.f32 %v3983_v19, 0.0 }
 0x44c   : > { %3511 = vst.msk [vmem:[%s367_s11 + $0x38] sm:$0xff] %vm2779_vm12, %v3503_v61 }
 0x44d   : > { %3509 = vst.msk [vmem:[%s367_s11 + $0x28] sm:$0xff] %vm2779_vm12, %v3501_v39 }
 0x44e   : > { %4190 = shalt.err (!%p4187_p3)
}
 0x44f   : > { %s4191_s29 = scalar_lea.hbm %s5637_s25, 1024  ;;  %s4195_s27 = scalar_lea.hbm %s5698_s10, 2048 }
 0x450   : > { %p4192_p4 = scmp.ne.s32.totalorder %s5637_s25, %s4191_s29  ;;  %p4196_p9 = scmp.lt.u32.totalorder %s5637_s25, %s5698_s10 }
 0x451   : > { %p4197_p10 = scmp.lt.u32.totalorder %s4195_s27, %s4191_s29  ;;  %p4199_p12 = scmp.lt.u32.totalorder %s4191_s29, %s5637_s25 }
 0x452   : > { %p4193_p7 = pnand %p4192_p4, %p4345_p5 }
 0x453   : > { %p4198_p11 = por %p4197_p10, %p4196_p9 }
 0x454   : > { %p4194_p8 = pneg %p4193_p7 }
 0x455   : > { %p4200_p13 = por %p4199_p12, %p4198_p11 }
 0x457   : > { %p4201_p0 = pnand %p4200_p13, %p4194_p8 }
 0x459   : > { %4204 = shalt.err (!%p4201_p0)
}
 0x45a   : > { %s4251_s26 = smov 128  }
 0x45b   : > { %3997 = dma.vmem_to_hbm [thread:$0]  (%p4345_p5), %s5640_s21, 1024, %s5637_s25, %s5646_s17, %s4251_s26, %s4251_s26, %s4242_s12  }
 0x45c PF: > { %p4003_p1 = scmp.ge.s32.totalorder %s4239_s16, 2  ;;  %s3541_s20 = sand.u32 1, %s4227_s13  }
 0x45d   : > { %s3542_s29 = scalar_lea.sflag [#allocation5], %s3541_s20 }
 0x45e   : > { %p4000_p2 = pnand %p4003_p1, %p4349_p6 }
 0x460   : > { %4222 = dma.done.wait (!%p4000_p2), %s3542_s29, 1024  }
 0x461   : > { %4224 = vsyncadd (!%p4000_p2), %s3542_s29, 4294966272  ;;  %p20_p3 = scmp.ge.s32.totalorder %s4332_s19, 4   ;;  %s5707_s13 = smov %s4231_s14 }
 0x462   : > { %s5708_s14 = smov %s4235_s15  ;;  %s5709_s15 = smov %s4343_s22 }
 0x463   : > { %s5710_s16 = smov %s4332_s19  ;;  %22 = sbr.rel (!%p20_p3) target bundleno = 3 (0x3), region = 116 }
 0x46a   :  { %3547 = vsyncpa [#allocation5], 1 }
 0x46b   :  { %3549 = vsyncpa [#allocation5 + $0x1], 1 }

</bundles_post_ra>
